<compile_context>
chip_gen: v7x
topology: tpu7x:2x2x1
jax: 0.10.0
libtpu: 0.0.40
codegen_flags: <defaults>
</compile_context>

<pallas_src>
import functools

import jax
import jax.numpy as jnp
from jax.experimental import pallas as pl
from jax.experimental.pallas import tpu as pltpu


# ---------------- in-kernel helpers (traced inside the Pallas body) -------------

def _layer_norm(x, gamma, beta, eps=1e-5):
    # x: (L, E) f32; gamma/beta: (1, E) f32
    mean = jnp.mean(x, axis=-1, keepdims=True)
    var = jnp.mean(jnp.square(x - mean), axis=-1, keepdims=True)
    return (x - mean) * jax.lax.rsqrt(var + eps) * gamma + beta


def _mha(x_q, x_kv, wqkv_ref, bqkv_ref, wo_ref, bo_ref, mask_bias,
         num_heads, head_dim, fused_qkv):
    """Multi-head attention on one (L, E) tile.

    x_q, x_kv : (L, E) bf16
    wqkv_ref  : (E, 3E) bf16  [Wq | Wk | Wv] in (in, out) layout
    bqkv_ref  : (1, 3E) f32
    wo_ref    : (H, d, E) bf16 (output projection split per head)
    bo_ref    : (1, E) f32
    mask_bias : (L, L) f32 additive bias (0 = keep, -1e10 = masked)
    """
    E = num_heads * head_dim
    wqkv = wqkv_ref[...]
    bqkv = bqkv_ref[...]

    if fused_qkv:
        qkv = jnp.dot(x_q, wqkv, preferred_element_type=jnp.float32) + bqkv
        q, k, v = qkv[:, :E], qkv[:, E:2 * E], qkv[:, 2 * E:]
    else:
        q = jnp.dot(x_q, wqkv[:, :E], preferred_element_type=jnp.float32) + bqkv[:, :E]
        kv = jnp.dot(x_kv, wqkv[:, E:], preferred_element_type=jnp.float32) + bqkv[:, E:]
        k, v = kv[:, :E], kv[:, E:]

    q = q.astype(jnp.bfloat16)
    k = k.astype(jnp.bfloat16)
    v = v.astype(jnp.bfloat16)
    scale = jnp.float32(1.0 / (head_dim ** 0.5))

    acc = jnp.zeros((x_q.shape[0], E), jnp.float32)
    for h in range(num_heads):                      # static unroll over heads
        sl = slice(h * head_dim, (h + 1) * head_dim)
        qh, kh, vh = q[:, sl], k[:, sl], v[:, sl]
        # scores = qh @ kh.T (contract over head_dim, no explicit transpose)
        s = jax.lax.dot_general(qh, kh, (((1,), (1,)), ((), ())),
                                preferred_element_type=jnp.float32)
        s = s * scale + mask_bias
        s = s - jnp.max(s, axis=-1, keepdims=True)
        p = jnp.exp(s)
        p = p * pl.reciprocal(jnp.sum(p, axis=-1, keepdims=True), approx=True)
        head_out = jnp.dot(p.astype(jnp.bfloat16), vh,
                           preferred_element_type=jnp.float32)          # (L, d) f32
        # fold into the output projection: no concat, just accumulate partial matmuls
        acc = acc + jnp.dot(head_out.astype(jnp.bfloat16), wo_ref[h],
                            preferred_element_type=jnp.float32)
    return acc + bo_ref[...]


# -------------------------------- Pallas kernel ---------------------------------

def decoder_layer_kernel(enc_len_ref,                       # scalar prefetch (SMEM, (B,) int32)
                         x_ref, enc_ref,
                         w1qkv_ref, b1qkv_ref, w1o_ref, b1o_ref,
                         w2qkv_ref, b2qkv_ref, w2o_ref, b2o_ref,
                         ffn_w1_ref, ffn_b1_ref, ffn_w2_ref, ffn_b2_ref,
                         ln_g_ref, ln_b_ref,
                         out_ref, *, num_heads, head_dim):
    b = pl.program_id(0)
    L = x_ref.shape[1]

    x = x_ref[0]        # (L, E) bf16
    enc = enc_ref[0]    # (L, E) bf16

    # Masks generated in-kernel as additive biases (no (B,L,L) mask DMA from HBM).
    neg = jnp.float32(-1e10)
    zero = jnp.float32(0.0)
    row = jax.lax.broadcasted_iota(jnp.int32, (L, L), 0)
    col = jax.lax.broadcasted_iota(jnp.int32, (L, L), 1)
    causal_bias = jnp.where(col <= row, zero, neg)              # causal self-attention mask
    pad_bias = jnp.where(col < enc_len_ref[b], zero, neg)       # encoder key padding mask

    # masked self-attention + residual + norm1
    attn1 = _mha(x, x, w1qkv_ref, b1qkv_ref, w1o_ref, b1o_ref,
                 causal_bias, num_heads, head_dim, fused_qkv=True)
    l1 = _layer_norm(x.astype(jnp.float32) + attn1, ln_g_ref[0:1, :], ln_b_ref[0:1, :])
    l1_bf = l1.astype(jnp.bfloat16)

    # cross-attention over encoder output + residual + norm2
    attn2 = _mha(l1_bf, enc, w2qkv_ref, b2qkv_ref, w2o_ref, b2o_ref,
                 pad_bias, num_heads, head_dim, fused_qkv=False)
    l2 = _layer_norm(l1 + attn2, ln_g_ref[1:2, :], ln_b_ref[1:2, :])
    l2_bf = l2.astype(jnp.bfloat16)

    # feed-forward + residual + norm3
    h = jnp.dot(l2_bf, ffn_w1_ref[...], preferred_element_type=jnp.float32) + ffn_b1_ref[...]
    h = jnp.maximum(h, 0.0)
    ff = jnp.dot(h.astype(jnp.bfloat16), ffn_w2_ref[...],
                 preferred_element_type=jnp.float32) + ffn_b2_ref[...]
    out = _layer_norm(l2 + ff, ln_g_ref[2:3, :], ln_b_ref[2:3, :])
    out_ref[0] = out.astype(out_ref.dtype)


# --------------------------------- wrapper --------------------------------------

def decoder_layer(x, enc, enc_valid_len, params, num_heads):
    B, L, E = x.shape
    F = params["ffn_w1"].shape[1]
    head_dim = E // num_heads
    assert head_dim * num_heads == E

    # index_maps receive (grid_idx, *scalar_prefetch_refs)
    data_spec = pl.BlockSpec((1, L, E), lambda b, lens: (b, 0, 0))

    def full_spec(shape):
        n = len(shape)
        return pl.BlockSpec(shape, lambda b, lens, n=n: (0,) * n)

    in_specs = [
        data_spec, data_spec,
        full_spec((E, 3 * E)), full_spec((1, 3 * E)),
        full_spec((num_heads, head_dim, E)), full_spec((1, E)),
        full_spec((E, 3 * E)), full_spec((1, 3 * E)),
        full_spec((num_heads, head_dim, E)), full_spec((1, E)),
        full_spec((E, F)), full_spec((1, F)),
        full_spec((F, E)), full_spec((1, E)),
        full_spec((3, E)), full_spec((3, E)),
    ]
    out_spec = pl.BlockSpec((1, L, E), lambda b, lens: (b, 0, 0))

    kernel = functools.partial(decoder_layer_kernel,
                               num_heads=num_heads, head_dim=head_dim)

    # Advisory cost estimate for XLA's scheduler.
    flops = int(B * (16 * L * E * E + 8 * L * L * E + 4 * L * E * F))
    transcendentals = int(2 * B * num_heads * L * L)
    param_bytes = sum(int(v.size) * v.dtype.itemsize for v in params.values())
    act_bytes = int(3 * B * L * E * 2)                      # x + enc + out, bf16
    cost = pl.CostEstimate(flops=flops, transcendentals=transcendentals,
                           bytes_accessed=param_bytes + act_bytes)

    # Scoped VMEM sized from actual resident buffers (double-buffered), capped at 64 MiB (v7x).
    resident = 2 * (param_bytes + 3 * L * E * 2) + (1 << 20)
    vmem_limit = int(min(64 * 1024 * 1024, max(16 * 1024 * 1024, resident)))

    return pl.pallas_call(
        kernel,
        out_shape=jax.ShapeDtypeStruct((B, L, E), jnp.bfloat16),
        grid_spec=pltpu.PrefetchScalarGridSpec(
            num_scalar_prefetch=1,
            grid=(B,),
            in_specs=in_specs,
            out_specs=out_spec,
        ),
        compiler_params=pltpu.CompilerParams(
            dimension_semantics=("parallel",),
            vmem_limit_bytes=vmem_limit,
        ),
        cost_estimate=cost,
    )(enc_valid_len, x, enc,
      params["mha1_wqkv"], params["mha1_bqkv"], params["mha1_wo"], params["mha1_bo"],
      params["mha2_wqkv"], params["mha2_bqkv"], params["mha2_wo"], params["mha2_bo"],
      params["ffn_w1"], params["ffn_b1"], params["ffn_w2"], params["ffn_b2"],
      params["ln_g"], params["ln_b"])


# ----------------------------- parameter creation -------------------------------

def make_params(key, embedding_dim, feed_forward_dim, num_heads):
    E, F = embedding_dim, feed_forward_dim
    d = E // num_heads
    keys = jax.random.split(key, 12)
    s = 0.02

    def nrm(k, shape):
        return s * jax.random.normal(k, shape, jnp.float32)

    return {
        # fused [Wq | Wk | Wv], each (in=E, out=E), stored (E, 3E) in bf16
        "mha1_wqkv": nrm(keys[0], (E, 3 * E)).astype(jnp.bfloat16),
        "mha1_bqkv": nrm(keys[1], (1, 3 * E)),
        # output projection stored per head: (H, d, E) bf16
        "mha1_wo": nrm(keys[2], (E, E)).reshape(num_heads, d, E).astype(jnp.bfloat16),
        "mha1_bo": nrm(keys[3], (1, E)),
        "mha2_wqkv": nrm(keys[4], (E, 3 * E)).astype(jnp.bfloat16),
        "mha2_bqkv": nrm(keys[5], (1, 3 * E)),
        "mha2_wo": nrm(keys[6], (E, E)).reshape(num_heads, d, E).astype(jnp.bfloat16),
        "mha2_bo": nrm(keys[7], (1, E)),
        "ffn_w1": nrm(keys[8], (E, F)).astype(jnp.bfloat16),
        "ffn_b1": nrm(keys[9], (1, F)),
        "ffn_w2": nrm(keys[10], (F, E)).astype(jnp.bfloat16),
        "ffn_b2": nrm(keys[11], (1, E)),
        # LayerNorm default init: gamma=1, beta=0 (stacked for the 3 norms), f32
        "ln_g": jnp.ones((3, E), jnp.float32),
        "ln_b": jnp.zeros((3, E), jnp.float32),
    }


# ------------------------------------ main ---------------------------------------

if __name__ == "__main__":
    B, L, E, H, F = 2, 8, 32, 4, 64

    key = jax.random.PRNGKey(0)
    k_x, k_enc, k_p = jax.random.split(key, 3)

    x = jax.random.normal(k_x, (B, L, E), jnp.float32).astype(jnp.bfloat16)
    enc = jax.random.normal(k_enc, (B, L, E), jnp.float32).astype(jnp.bfloat16)

    # per-batch encoder valid lengths (replaces the (B, L, L) padding mask):
    # batch 0 has 8 valid encoder tokens, batch 1 has 6; causal mask is built in-kernel.
    enc_valid_len = jnp.array([8, 6], jnp.int32)

    params = make_params(k_p, E, F, num_heads=H)

    out = decoder_layer(x, enc, enc_valid_len, params, num_heads=H)
    out = jax.block_until_ready(out)
    assert out.shape == (B, L, E)
    print("KERNEL_OK")
</pallas_src>

<mosaic_0001>
module attributes {stable_mosaic.version = 11 : i64} {
  func.func @decoder_layer_kernel(%arg0: i32, %arg1: memref<2xi32, #tpu.memory_space<smem>>, %arg2: memref<1x8x32xbf16, #tpu.memory_space<vmem>>, %arg3: memref<1x8x32xbf16, #tpu.memory_space<vmem>>, %arg4: memref<32x96xbf16, #tpu.memory_space<vmem>>, %arg5: memref<1x96xf32, #tpu.memory_space<vmem>>, %arg6: memref<4x8x32xbf16, #tpu.memory_space<vmem>>, %arg7: memref<1x32xf32, #tpu.memory_space<vmem>>, %arg8: memref<32x96xbf16, #tpu.memory_space<vmem>>, %arg9: memref<1x96xf32, #tpu.memory_space<vmem>>, %arg10: memref<4x8x32xbf16, #tpu.memory_space<vmem>>, %arg11: memref<1x32xf32, #tpu.memory_space<vmem>>, %arg12: memref<32x64xbf16, #tpu.memory_space<vmem>>, %arg13: memref<1x64xf32, #tpu.memory_space<vmem>>, %arg14: memref<64x32xbf16, #tpu.memory_space<vmem>>, %arg15: memref<1x32xf32, #tpu.memory_space<vmem>>, %arg16: memref<3x32xf32, #tpu.memory_space<vmem>>, %arg17: memref<3x32xf32, #tpu.memory_space<vmem>>, %arg18: memref<1x8x32xbf16, #tpu.memory_space<vmem>>) attributes {dimension_semantics = [#tpu.dimension_semantics<parallel>], iteration_bounds = array<i64: 2>, scalar_prefetch = 1 : i64, scratch_operands = 0 : i64, tpu.core_type = #tpu.core_type<tc>, window_params = [{transform_indices = @transform_0, window_bounds = array<i64: 1, 8, 32>}, {transform_indices = @transform_1, window_bounds = array<i64: 1, 8, 32>}, {pipeline_mode = #tpu.pipeline_mode<synchronous>, transform_indices = @transform_2, window_bounds = array<i64: 32, 96>}, {pipeline_mode = #tpu.pipeline_mode<synchronous>, transform_indices = @transform_3, window_bounds = array<i64: 1, 96>}, {pipeline_mode = #tpu.pipeline_mode<synchronous>, transform_indices = @transform_4, window_bounds = array<i64: 4, 8, 32>}, {pipeline_mode = #tpu.pipeline_mode<synchronous>, transform_indices = @transform_5, window_bounds = array<i64: 1, 32>}, {pipeline_mode = #tpu.pipeline_mode<synchronous>, transform_indices = @transform_6, window_bounds = array<i64: 32, 96>}, {pipeline_mode = #tpu.pipeline_mode<synchronous>, transform_indices = @transform_7, window_bounds = array<i64: 1, 96>}, {pipeline_mode = #tpu.pipeline_mode<synchronous>, transform_indices = @transform_8, window_bounds = array<i64: 4, 8, 32>}, {pipeline_mode = #tpu.pipeline_mode<synchronous>, transform_indices = @transform_9, window_bounds = array<i64: 1, 32>}, {pipeline_mode = #tpu.pipeline_mode<synchronous>, transform_indices = @transform_10, window_bounds = array<i64: 32, 64>}, {pipeline_mode = #tpu.pipeline_mode<synchronous>, transform_indices = @transform_11, window_bounds = array<i64: 1, 64>}, {pipeline_mode = #tpu.pipeline_mode<synchronous>, transform_indices = @transform_12, window_bounds = array<i64: 64, 32>}, {pipeline_mode = #tpu.pipeline_mode<synchronous>, transform_indices = @transform_13, window_bounds = array<i64: 1, 32>}, {pipeline_mode = #tpu.pipeline_mode<synchronous>, transform_indices = @transform_14, window_bounds = array<i64: 3, 32>}, {pipeline_mode = #tpu.pipeline_mode<synchronous>, transform_indices = @transform_15, window_bounds = array<i64: 3, 32>}, {transform_indices = @transform_16, window_bounds = array<i64: 1, 8, 32>}]} {
    %c0 = arith.constant 0 : index
    %c0_0 = arith.constant 0 : index
    %c0_1 = arith.constant 0 : index
    %0 = vector.load %arg2[%c0, %c0_0, %c0_1] : memref<1x8x32xbf16, #tpu.memory_space<vmem>>, vector<1x8x32xbf16>
    %1 = vector.shape_cast %0 : vector<1x8x32xbf16> to vector<8x32xbf16>
    %c0_2 = arith.constant 0 : index
    %c0_3 = arith.constant 0 : index
    %c0_4 = arith.constant 0 : index
    %2 = vector.load %arg3[%c0_2, %c0_3, %c0_4] : memref<1x8x32xbf16, #tpu.memory_space<vmem>>, vector<1x8x32xbf16>
    %3 = vector.shape_cast %2 : vector<1x8x32xbf16> to vector<8x32xbf16>
    %4 = tpu.iota {dimensions = array<i32: 0>} : vector<8x8xi32>
    %5 = tpu.iota {dimensions = array<i32: 1>} : vector<8x8xi32>
    %6 = arith.cmpi sle, %5, %4 : vector<8x8xi32>
    %cst = arith.constant 0.000000e+00 : f32
    %cst_5 = arith.constant -1.000000e+10 : f32
    %7 = vector.broadcast %cst : f32 to vector<8x8xf32>
    %8 = vector.broadcast %cst_5 : f32 to vector<8x8xf32>
    %9 = arith.select %6, %7, %8 : vector<8x8xi1>, vector<8x8xf32>
    %10 = arith.index_cast %arg0 : i32 to index
    %11 = memref.load %arg1[%10] : memref<2xi32, #tpu.memory_space<smem>>
    %12 = vector.broadcast %11 : i32 to vector<8x8xi32>
    %13 = arith.cmpi slt, %5, %12 : vector<8x8xi32>
    %cst_6 = arith.constant 0.000000e+00 : f32
    %cst_7 = arith.constant -1.000000e+10 : f32
    %14 = vector.broadcast %cst_6 : f32 to vector<8x8xf32>
    %15 = vector.broadcast %cst_7 : f32 to vector<8x8xf32>
    %16 = arith.select %13, %14, %15 : vector<8x8xi1>, vector<8x8xf32>
    %c0_8 = arith.constant 0 : index
    %c0_9 = arith.constant 0 : index
    %17 = vector.load %arg4[%c0_8, %c0_9] : memref<32x96xbf16, #tpu.memory_space<vmem>>, vector<32x96xbf16>
    %c0_10 = arith.constant 0 : index
    %c0_11 = arith.constant 0 : index
    %18 = vector.load %arg5[%c0_10, %c0_11] : memref<1x96xf32, #tpu.memory_space<vmem>>, vector<1x96xf32>
    %cst_12 = arith.constant dense<0.000000e+00> : vector<8x96xf32>
    %19 = tpu.matmul %1, %17, %cst_12 {dimension_numbers = #tpu.dot_dimension_numbers<[1], [0], [0], [1], [0, 0, 1, 1], [], []>} : vector<8x32xbf16>, vector<32x96xbf16>, vector<8x96xf32> -> vector<8x96xf32>
    %20 = vector.broadcast %18 : vector<1x96xf32> to vector<8x96xf32>
    %21 = arith.addf %19, %20 : vector<8x96xf32>
    %22 = vector.extract_strided_slice %21 {offsets = [0, 0], sizes = [8, 32], strides = [1, 1]} : vector<8x96xf32> to vector<8x32xf32>
    %23 = vector.extract_strided_slice %21 {offsets = [0, 32], sizes = [8, 32], strides = [1, 1]} : vector<8x96xf32> to vector<8x32xf32>
    %24 = vector.extract_strided_slice %21 {offsets = [0, 64], sizes = [8, 32], strides = [1, 1]} : vector<8x96xf32> to vector<8x32xf32>
    %25 = arith.truncf %22 : vector<8x32xf32> to vector<8x32xbf16>
    %26 = arith.truncf %23 : vector<8x32xf32> to vector<8x32xbf16>
    %27 = arith.truncf %24 : vector<8x32xf32> to vector<8x32xbf16>
    %cst_13 = arith.constant 0.000000e+00 : f32
    %28 = vector.broadcast %cst_13 : f32 to vector<8x32xf32>
    %29 = vector.extract_strided_slice %25 {offsets = [0, 0], sizes = [8, 8], strides = [1, 1]} : vector<8x32xbf16> to vector<8x8xbf16>
    %30 = vector.extract_strided_slice %26 {offsets = [0, 0], sizes = [8, 8], strides = [1, 1]} : vector<8x32xbf16> to vector<8x8xbf16>
    %31 = vector.extract_strided_slice %27 {offsets = [0, 0], sizes = [8, 8], strides = [1, 1]} : vector<8x32xbf16> to vector<8x8xbf16>
    %cst_14 = arith.constant dense<0.000000e+00> : vector<8x8xf32>
    %32 = tpu.matmul %29, %30, %cst_14 {dimension_numbers = #tpu.dot_dimension_numbers<[1], [1], [0], [0], [0, 0, 1, 0], [], []>} : vector<8x8xbf16>, vector<8x8xbf16>, vector<8x8xf32> -> vector<8x8xf32>
    %cst_15 = arith.constant 0.353553385 : f32
    %33 = vector.broadcast %cst_15 : f32 to vector<8x8xf32>
    %34 = arith.mulf %32, %33 : vector<8x8xf32>
    %35 = arith.addf %34, %9 : vector<8x8xf32>
    %cst_16 = arith.constant dense<0xFF800000> : vector<8xf32>
    %36 = vector.multi_reduction <maximumf>, %35, %cst_16 [1] : vector<8x8xf32> to vector<8xf32>
    %37 = vector.shape_cast %36 : vector<8xf32> to vector<8x1xf32>
    %38 = vector.broadcast %37 : vector<8x1xf32> to vector<8x8xf32>
    %39 = arith.subf %35, %38 : vector<8x8xf32>
    %40 = math.exp %39 : vector<8x8xf32>
    %cst_17 = arith.constant dense<0.000000e+00> : vector<8xf32>
    %41 = vector.multi_reduction <add>, %40, %cst_17 [1] : vector<8x8xf32> to vector<8xf32>
    %42 = vector.shape_cast %41 : vector<8xf32> to vector<8x1xf32>
    %43 = tpu.reciprocal %42 {approx = true} : vector<8x1xf32> -> vector<8x1xf32>
    %44 = vector.broadcast %43 : vector<8x1xf32> to vector<8x8xf32>
    %45 = arith.mulf %40, %44 : vector<8x8xf32>
    %46 = arith.truncf %45 : vector<8x8xf32> to vector<8x8xbf16>
    %cst_18 = arith.constant dense<0.000000e+00> : vector<8x8xf32>
    %47 = tpu.matmul %46, %31, %cst_18 {dimension_numbers = #tpu.dot_dimension_numbers<[1], [0], [0], [1], [0, 0, 1, 1], [], []>} : vector<8x8xbf16>, vector<8x8xbf16>, vector<8x8xf32> -> vector<8x8xf32>
    %48 = arith.truncf %47 : vector<8x8xf32> to vector<8x8xbf16>
    %c0_19 = arith.constant 0 : index
    %c0_20 = arith.constant 0 : index
    %c0_21 = arith.constant 0 : index
    %49 = vector.load %arg6[%c0_19, %c0_20, %c0_21] : memref<4x8x32xbf16, #tpu.memory_space<vmem>>, vector<1x8x32xbf16>
    %50 = vector.shape_cast %49 : vector<1x8x32xbf16> to vector<8x32xbf16>
    %cst_22 = arith.constant dense<0.000000e+00> : vector<8x32xf32>
    %51 = tpu.matmul %48, %50, %cst_22 {dimension_numbers = #tpu.dot_dimension_numbers<[1], [0], [0], [1], [0, 0, 1, 1], [], []>} : vector<8x8xbf16>, vector<8x32xbf16>, vector<8x32xf32> -> vector<8x32xf32>
    %52 = arith.addf %28, %51 : vector<8x32xf32>
    %53 = vector.extract_strided_slice %25 {offsets = [0, 8], sizes = [8, 8], strides = [1, 1]} : vector<8x32xbf16> to vector<8x8xbf16>
    %54 = vector.extract_strided_slice %26 {offsets = [0, 8], sizes = [8, 8], strides = [1, 1]} : vector<8x32xbf16> to vector<8x8xbf16>
    %55 = vector.extract_strided_slice %27 {offsets = [0, 8], sizes = [8, 8], strides = [1, 1]} : vector<8x32xbf16> to vector<8x8xbf16>
    %cst_23 = arith.constant dense<0.000000e+00> : vector<8x8xf32>
    %56 = tpu.matmul %53, %54, %cst_23 {dimension_numbers = #tpu.dot_dimension_numbers<[1], [1], [0], [0], [0, 0, 1, 0], [], []>} : vector<8x8xbf16>, vector<8x8xbf16>, vector<8x8xf32> -> vector<8x8xf32>
    %cst_24 = arith.constant 0.353553385 : f32
    %57 = vector.broadcast %cst_24 : f32 to vector<8x8xf32>
    %58 = arith.mulf %56, %57 : vector<8x8xf32>
    %59 = arith.addf %58, %9 : vector<8x8xf32>
    %cst_25 = arith.constant dense<0xFF800000> : vector<8xf32>
    %60 = vector.multi_reduction <maximumf>, %59, %cst_25 [1] : vector<8x8xf32> to vector<8xf32>
    %61 = vector.shape_cast %60 : vector<8xf32> to vector<8x1xf32>
    %62 = vector.broadcast %61 : vector<8x1xf32> to vector<8x8xf32>
    %63 = arith.subf %59, %62 : vector<8x8xf32>
    %64 = math.exp %63 : vector<8x8xf32>
    %cst_26 = arith.constant dense<0.000000e+00> : vector<8xf32>
    %65 = vector.multi_reduction <add>, %64, %cst_26 [1] : vector<8x8xf32> to vector<8xf32>
    %66 = vector.shape_cast %65 : vector<8xf32> to vector<8x1xf32>
    %67 = tpu.reciprocal %66 {approx = true} : vector<8x1xf32> -> vector<8x1xf32>
    %68 = vector.broadcast %67 : vector<8x1xf32> to vector<8x8xf32>
    %69 = arith.mulf %64, %68 : vector<8x8xf32>
    %70 = arith.truncf %69 : vector<8x8xf32> to vector<8x8xbf16>
    %cst_27 = arith.constant dense<0.000000e+00> : vector<8x8xf32>
    %71 = tpu.matmul %70, %55, %cst_27 {dimension_numbers = #tpu.dot_dimension_numbers<[1], [0], [0], [1], [0, 0, 1, 1], [], []>} : vector<8x8xbf16>, vector<8x8xbf16>, vector<8x8xf32> -> vector<8x8xf32>
    %72 = arith.truncf %71 : vector<8x8xf32> to vector<8x8xbf16>
    %c1 = arith.constant 1 : index
    %c0_28 = arith.constant 0 : index
    %c0_29 = arith.constant 0 : index
    %73 = vector.load %arg6[%c1, %c0_28, %c0_29] : memref<4x8x32xbf16, #tpu.memory_space<vmem>>, vector<1x8x32xbf16>
    %74 = vector.shape_cast %73 : vector<1x8x32xbf16> to vector<8x32xbf16>
    %cst_30 = arith.constant dense<0.000000e+00> : vector<8x32xf32>
    %75 = tpu.matmul %72, %74, %cst_30 {dimension_numbers = #tpu.dot_dimension_numbers<[1], [0], [0], [1], [0, 0, 1, 1], [], []>} : vector<8x8xbf16>, vector<8x32xbf16>, vector<8x32xf32> -> vector<8x32xf32>
    %76 = arith.addf %52, %75 : vector<8x32xf32>
    %77 = vector.extract_strided_slice %25 {offsets = [0, 16], sizes = [8, 8], strides = [1, 1]} : vector<8x32xbf16> to vector<8x8xbf16>
    %78 = vector.extract_strided_slice %26 {offsets = [0, 16], sizes = [8, 8], strides = [1, 1]} : vector<8x32xbf16> to vector<8x8xbf16>
    %79 = vector.extract_strided_slice %27 {offsets = [0, 16], sizes = [8, 8], strides = [1, 1]} : vector<8x32xbf16> to vector<8x8xbf16>
    %cst_31 = arith.constant dense<0.000000e+00> : vector<8x8xf32>
    %80 = tpu.matmul %77, %78, %cst_31 {dimension_numbers = #tpu.dot_dimension_numbers<[1], [1], [0], [0], [0, 0, 1, 0], [], []>} : vector<8x8xbf16>, vector<8x8xbf16>, vector<8x8xf32> -> vector<8x8xf32>
    %cst_32 = arith.constant 0.353553385 : f32
    %81 = vector.broadcast %cst_32 : f32 to vector<8x8xf32>
    %82 = arith.mulf %80, %81 : vector<8x8xf32>
    %83 = arith.addf %82, %9 : vector<8x8xf32>
    %cst_33 = arith.constant dense<0xFF800000> : vector<8xf32>
    %84 = vector.multi_reduction <maximumf>, %83, %cst_33 [1] : vector<8x8xf32> to vector<8xf32>
    %85 = vector.shape_cast %84 : vector<8xf32> to vector<8x1xf32>
    %86 = vector.broadcast %85 : vector<8x1xf32> to vector<8x8xf32>
    %87 = arith.subf %83, %86 : vector<8x8xf32>
    %88 = math.exp %87 : vector<8x8xf32>
    %cst_34 = arith.constant dense<0.000000e+00> : vector<8xf32>
    %89 = vector.multi_reduction <add>, %88, %cst_34 [1] : vector<8x8xf32> to vector<8xf32>
    %90 = vector.shape_cast %89 : vector<8xf32> to vector<8x1xf32>
    %91 = tpu.reciprocal %90 {approx = true} : vector<8x1xf32> -> vector<8x1xf32>
    %92 = vector.broadcast %91 : vector<8x1xf32> to vector<8x8xf32>
    %93 = arith.mulf %88, %92 : vector<8x8xf32>
    %94 = arith.truncf %93 : vector<8x8xf32> to vector<8x8xbf16>
    %cst_35 = arith.constant dense<0.000000e+00> : vector<8x8xf32>
    %95 = tpu.matmul %94, %79, %cst_35 {dimension_numbers = #tpu.dot_dimension_numbers<[1], [0], [0], [1], [0, 0, 1, 1], [], []>} : vector<8x8xbf16>, vector<8x8xbf16>, vector<8x8xf32> -> vector<8x8xf32>
    %96 = arith.truncf %95 : vector<8x8xf32> to vector<8x8xbf16>
    %c2 = arith.constant 2 : index
    %c0_36 = arith.constant 0 : index
    %c0_37 = arith.constant 0 : index
    %97 = vector.load %arg6[%c2, %c0_36, %c0_37] : memref<4x8x32xbf16, #tpu.memory_space<vmem>>, vector<1x8x32xbf16>
    %98 = vector.shape_cast %97 : vector<1x8x32xbf16> to vector<8x32xbf16>
    %cst_38 = arith.constant dense<0.000000e+00> : vector<8x32xf32>
    %99 = tpu.matmul %96, %98, %cst_38 {dimension_numbers = #tpu.dot_dimension_numbers<[1], [0], [0], [1], [0, 0, 1, 1], [], []>} : vector<8x8xbf16>, vector<8x32xbf16>, vector<8x32xf32> -> vector<8x32xf32>
    %100 = arith.addf %76, %99 : vector<8x32xf32>
    %101 = vector.extract_strided_slice %25 {offsets = [0, 24], sizes = [8, 8], strides = [1, 1]} : vector<8x32xbf16> to vector<8x8xbf16>
    %102 = vector.extract_strided_slice %26 {offsets = [0, 24], sizes = [8, 8], strides = [1, 1]} : vector<8x32xbf16> to vector<8x8xbf16>
    %103 = vector.extract_strided_slice %27 {offsets = [0, 24], sizes = [8, 8], strides = [1, 1]} : vector<8x32xbf16> to vector<8x8xbf16>
    %cst_39 = arith.constant dense<0.000000e+00> : vector<8x8xf32>
    %104 = tpu.matmul %101, %102, %cst_39 {dimension_numbers = #tpu.dot_dimension_numbers<[1], [1], [0], [0], [0, 0, 1, 0], [], []>} : vector<8x8xbf16>, vector<8x8xbf16>, vector<8x8xf32> -> vector<8x8xf32>
    %cst_40 = arith.constant 0.353553385 : f32
    %105 = vector.broadcast %cst_40 : f32 to vector<8x8xf32>
    %106 = arith.mulf %104, %105 : vector<8x8xf32>
    %107 = arith.addf %106, %9 : vector<8x8xf32>
    %cst_41 = arith.constant dense<0xFF800000> : vector<8xf32>
    %108 = vector.multi_reduction <maximumf>, %107, %cst_41 [1] : vector<8x8xf32> to vector<8xf32>
    %109 = vector.shape_cast %108 : vector<8xf32> to vector<8x1xf32>
    %110 = vector.broadcast %109 : vector<8x1xf32> to vector<8x8xf32>
    %111 = arith.subf %107, %110 : vector<8x8xf32>
    %112 = math.exp %111 : vector<8x8xf32>
    %cst_42 = arith.constant dense<0.000000e+00> : vector<8xf32>
    %113 = vector.multi_reduction <add>, %112, %cst_42 [1] : vector<8x8xf32> to vector<8xf32>
    %114 = vector.shape_cast %113 : vector<8xf32> to vector<8x1xf32>
    %115 = tpu.reciprocal %114 {approx = true} : vector<8x1xf32> -> vector<8x1xf32>
    %116 = vector.broadcast %115 : vector<8x1xf32> to vector<8x8xf32>
    %117 = arith.mulf %112, %116 : vector<8x8xf32>
    %118 = arith.truncf %117 : vector<8x8xf32> to vector<8x8xbf16>
    %cst_43 = arith.constant dense<0.000000e+00> : vector<8x8xf32>
    %119 = tpu.matmul %118, %103, %cst_43 {dimension_numbers = #tpu.dot_dimension_numbers<[1], [0], [0], [1], [0, 0, 1, 1], [], []>} : vector<8x8xbf16>, vector<8x8xbf16>, vector<8x8xf32> -> vector<8x8xf32>
    %120 = arith.truncf %119 : vector<8x8xf32> to vector<8x8xbf16>
    %c3 = arith.constant 3 : index
    %c0_44 = arith.constant 0 : index
    %c0_45 = arith.constant 0 : index
    %121 = vector.load %arg6[%c3, %c0_44, %c0_45] : memref<4x8x32xbf16, #tpu.memory_space<vmem>>, vector<1x8x32xbf16>
    %122 = vector.shape_cast %121 : vector<1x8x32xbf16> to vector<8x32xbf16>
    %cst_46 = arith.constant dense<0.000000e+00> : vector<8x32xf32>
    %123 = tpu.matmul %120, %122, %cst_46 {dimension_numbers = #tpu.dot_dimension_numbers<[1], [0], [0], [1], [0, 0, 1, 1], [], []>} : vector<8x8xbf16>, vector<8x32xbf16>, vector<8x32xf32> -> vector<8x32xf32>
    %124 = arith.addf %100, %123 : vector<8x32xf32>
    %c0_47 = arith.constant 0 : index
    %c0_48 = arith.constant 0 : index
    %125 = vector.load %arg7[%c0_47, %c0_48] : memref<1x32xf32, #tpu.memory_space<vmem>>, vector<1x32xf32>
    %126 = vector.broadcast %125 : vector<1x32xf32> to vector<8x32xf32>
    %127 = arith.addf %124, %126 : vector<8x32xf32>
    %128 = arith.extf %1 : vector<8x32xbf16> to vector<8x32xf32>
    %129 = arith.addf %128, %127 : vector<8x32xf32>
    %c0_49 = arith.constant 0 : index
    %c0_50 = arith.constant 0 : index
    %130 = vector.load %arg16[%c0_49, %c0_50] : memref<3x32xf32, #tpu.memory_space<vmem>>, vector<1x32xf32>
    %c0_51 = arith.constant 0 : index
    %c0_52 = arith.constant 0 : index
    %131 = vector.load %arg17[%c0_51, %c0_52] : memref<3x32xf32, #tpu.memory_space<vmem>>, vector<1x32xf32>
    %cst_53 = arith.constant dense<0.000000e+00> : vector<8xf32>
    %132 = vector.multi_reduction <add>, %129, %cst_53 [1] : vector<8x32xf32> to vector<8xf32>
    %133 = vector.shape_cast %132 : vector<8xf32> to vector<8x1xf32>
    %cst_54 = arith.constant 3.200000e+01 : f32
    %134 = vector.broadcast %cst_54 : f32 to vector<8x1xf32>
    %135 = arith.divf %133, %134 : vector<8x1xf32>
    %136 = vector.broadcast %135 : vector<8x1xf32> to vector<8x32xf32>
    %137 = arith.subf %129, %136 : vector<8x32xf32>
    %138 = arith.mulf %137, %137 : vector<8x32xf32>
    %cst_55 = arith.constant dense<0.000000e+00> : vector<8xf32>
    %139 = vector.multi_reduction <add>, %138, %cst_55 [1] : vector<8x32xf32> to vector<8xf32>
    %140 = vector.shape_cast %139 : vector<8xf32> to vector<8x1xf32>
    %cst_56 = arith.constant 3.200000e+01 : f32
    %141 = vector.broadcast %cst_56 : f32 to vector<8x1xf32>
    %142 = arith.divf %140, %141 : vector<8x1xf32>
    %143 = vector.broadcast %135 : vector<8x1xf32> to vector<8x32xf32>
    %144 = arith.subf %129, %143 : vector<8x32xf32>
    %cst_57 = arith.constant 9.99999974E-6 : f32
    %145 = vector.broadcast %cst_57 : f32 to vector<8x1xf32>
    %146 = arith.addf %142, %145 : vector<8x1xf32>
    %147 = math.rsqrt %146 : vector<8x1xf32>
    %148 = vector.broadcast %147 : vector<8x1xf32> to vector<8x32xf32>
    %149 = arith.mulf %144, %148 : vector<8x32xf32>
    %150 = vector.broadcast %130 : vector<1x32xf32> to vector<8x32xf32>
    %151 = arith.mulf %149, %150 : vector<8x32xf32>
    %152 = vector.broadcast %131 : vector<1x32xf32> to vector<8x32xf32>
    %153 = arith.addf %151, %152 : vector<8x32xf32>
    %154 = arith.truncf %153 : vector<8x32xf32> to vector<8x32xbf16>
    %c0_58 = arith.constant 0 : index
    %c0_59 = arith.constant 0 : index
    %155 = vector.load %arg8[%c0_58, %c0_59] : memref<32x96xbf16, #tpu.memory_space<vmem>>, vector<32x96xbf16>
    %c0_60 = arith.constant 0 : index
    %c0_61 = arith.constant 0 : index
    %156 = vector.load %arg9[%c0_60, %c0_61] : memref<1x96xf32, #tpu.memory_space<vmem>>, vector<1x96xf32>
    %157 = vector.extract_strided_slice %155 {offsets = [0, 0], sizes = [32, 32], strides = [1, 1]} : vector<32x96xbf16> to vector<32x32xbf16>
    %cst_62 = arith.constant dense<0.000000e+00> : vector<8x32xf32>
    %158 = tpu.matmul %154, %157, %cst_62 {dimension_numbers = #tpu.dot_dimension_numbers<[1], [0], [0], [1], [0, 0, 1, 1], [], []>} : vector<8x32xbf16>, vector<32x32xbf16>, vector<8x32xf32> -> vector<8x32xf32>
    %159 = vector.extract_strided_slice %156 {offsets = [0, 0], sizes = [1, 32], strides = [1, 1]} : vector<1x96xf32> to vector<1x32xf32>
    %160 = vector.broadcast %159 : vector<1x32xf32> to vector<8x32xf32>
    %161 = arith.addf %158, %160 : vector<8x32xf32>
    %162 = vector.extract_strided_slice %155 {offsets = [0, 32], sizes = [32, 64], strides = [1, 1]} : vector<32x96xbf16> to vector<32x64xbf16>
    %cst_63 = arith.constant dense<0.000000e+00> : vector<8x64xf32>
    %163 = tpu.matmul %3, %162, %cst_63 {dimension_numbers = #tpu.dot_dimension_numbers<[1], [0], [0], [1], [0, 0, 1, 1], [], []>} : vector<8x32xbf16>, vector<32x64xbf16>, vector<8x64xf32> -> vector<8x64xf32>
    %164 = vector.extract_strided_slice %156 {offsets = [0, 32], sizes = [1, 64], strides = [1, 1]} : vector<1x96xf32> to vector<1x64xf32>
    %165 = vector.broadcast %164 : vector<1x64xf32> to vector<8x64xf32>
    %166 = arith.addf %163, %165 : vector<8x64xf32>
    %167 = vector.extract_strided_slice %166 {offsets = [0, 0], sizes = [8, 32], strides = [1, 1]} : vector<8x64xf32> to vector<8x32xf32>
    %168 = vector.extract_strided_slice %166 {offsets = [0, 32], sizes = [8, 32], strides = [1, 1]} : vector<8x64xf32> to vector<8x32xf32>
    %169 = arith.truncf %161 : vector<8x32xf32> to vector<8x32xbf16>
    %170 = arith.truncf %167 : vector<8x32xf32> to vector<8x32xbf16>
    %171 = arith.truncf %168 : vector<8x32xf32> to vector<8x32xbf16>
    %cst_64 = arith.constant 0.000000e+00 : f32
    %172 = vector.broadcast %cst_64 : f32 to vector<8x32xf32>
    %173 = vector.extract_strided_slice %169 {offsets = [0, 0], sizes = [8, 8], strides = [1, 1]} : vector<8x32xbf16> to vector<8x8xbf16>
    %174 = vector.extract_strided_slice %170 {offsets = [0, 0], sizes = [8, 8], strides = [1, 1]} : vector<8x32xbf16> to vector<8x8xbf16>
    %175 = vector.extract_strided_slice %171 {offsets = [0, 0], sizes = [8, 8], strides = [1, 1]} : vector<8x32xbf16> to vector<8x8xbf16>
    %cst_65 = arith.constant dense<0.000000e+00> : vector<8x8xf32>
    %176 = tpu.matmul %173, %174, %cst_65 {dimension_numbers = #tpu.dot_dimension_numbers<[1], [1], [0], [0], [0, 0, 1, 0], [], []>} : vector<8x8xbf16>, vector<8x8xbf16>, vector<8x8xf32> -> vector<8x8xf32>
    %cst_66 = arith.constant 0.353553385 : f32
    %177 = vector.broadcast %cst_66 : f32 to vector<8x8xf32>
    %178 = arith.mulf %176, %177 : vector<8x8xf32>
    %179 = arith.addf %178, %16 : vector<8x8xf32>
    %cst_67 = arith.constant dense<0xFF800000> : vector<8xf32>
    %180 = vector.multi_reduction <maximumf>, %179, %cst_67 [1] : vector<8x8xf32> to vector<8xf32>
    %181 = vector.shape_cast %180 : vector<8xf32> to vector<8x1xf32>
    %182 = vector.broadcast %181 : vector<8x1xf32> to vector<8x8xf32>
    %183 = arith.subf %179, %182 : vector<8x8xf32>
    %184 = math.exp %183 : vector<8x8xf32>
    %cst_68 = arith.constant dense<0.000000e+00> : vector<8xf32>
    %185 = vector.multi_reduction <add>, %184, %cst_68 [1] : vector<8x8xf32> to vector<8xf32>
    %186 = vector.shape_cast %185 : vector<8xf32> to vector<8x1xf32>
    %187 = tpu.reciprocal %186 {approx = true} : vector<8x1xf32> -> vector<8x1xf32>
    %188 = vector.broadcast %187 : vector<8x1xf32> to vector<8x8xf32>
    %189 = arith.mulf %184, %188 : vector<8x8xf32>
    %190 = arith.truncf %189 : vector<8x8xf32> to vector<8x8xbf16>
    %cst_69 = arith.constant dense<0.000000e+00> : vector<8x8xf32>
    %191 = tpu.matmul %190, %175, %cst_69 {dimension_numbers = #tpu.dot_dimension_numbers<[1], [0], [0], [1], [0, 0, 1, 1], [], []>} : vector<8x8xbf16>, vector<8x8xbf16>, vector<8x8xf32> -> vector<8x8xf32>
    %192 = arith.truncf %191 : vector<8x8xf32> to vector<8x8xbf16>
    %c0_70 = arith.constant 0 : index
    %c0_71 = arith.constant 0 : index
    %c0_72 = arith.constant 0 : index
    %193 = vector.load %arg10[%c0_70, %c0_71, %c0_72] : memref<4x8x32xbf16, #tpu.memory_space<vmem>>, vector<1x8x32xbf16>
    %194 = vector.shape_cast %193 : vector<1x8x32xbf16> to vector<8x32xbf16>
    %cst_73 = arith.constant dense<0.000000e+00> : vector<8x32xf32>
    %195 = tpu.matmul %192, %194, %cst_73 {dimension_numbers = #tpu.dot_dimension_numbers<[1], [0], [0], [1], [0, 0, 1, 1], [], []>} : vector<8x8xbf16>, vector<8x32xbf16>, vector<8x32xf32> -> vector<8x32xf32>
    %196 = arith.addf %172, %195 : vector<8x32xf32>
    %197 = vector.extract_strided_slice %169 {offsets = [0, 8], sizes = [8, 8], strides = [1, 1]} : vector<8x32xbf16> to vector<8x8xbf16>
    %198 = vector.extract_strided_slice %170 {offsets = [0, 8], sizes = [8, 8], strides = [1, 1]} : vector<8x32xbf16> to vector<8x8xbf16>
    %199 = vector.extract_strided_slice %171 {offsets = [0, 8], sizes = [8, 8], strides = [1, 1]} : vector<8x32xbf16> to vector<8x8xbf16>
    %cst_74 = arith.constant dense<0.000000e+00> : vector<8x8xf32>
    %200 = tpu.matmul %197, %198, %cst_74 {dimension_numbers = #tpu.dot_dimension_numbers<[1], [1], [0], [0], [0, 0, 1, 0], [], []>} : vector<8x8xbf16>, vector<8x8xbf16>, vector<8x8xf32> -> vector<8x8xf32>
    %cst_75 = arith.constant 0.353553385 : f32
    %201 = vector.broadcast %cst_75 : f32 to vector<8x8xf32>
    %202 = arith.mulf %200, %201 : vector<8x8xf32>
    %203 = arith.addf %202, %16 : vector<8x8xf32>
    %cst_76 = arith.constant dense<0xFF800000> : vector<8xf32>
    %204 = vector.multi_reduction <maximumf>, %203, %cst_76 [1] : vector<8x8xf32> to vector<8xf32>
    %205 = vector.shape_cast %204 : vector<8xf32> to vector<8x1xf32>
    %206 = vector.broadcast %205 : vector<8x1xf32> to vector<8x8xf32>
    %207 = arith.subf %203, %206 : vector<8x8xf32>
    %208 = math.exp %207 : vector<8x8xf32>
    %cst_77 = arith.constant dense<0.000000e+00> : vector<8xf32>
    %209 = vector.multi_reduction <add>, %208, %cst_77 [1] : vector<8x8xf32> to vector<8xf32>
    %210 = vector.shape_cast %209 : vector<8xf32> to vector<8x1xf32>
    %211 = tpu.reciprocal %210 {approx = true} : vector<8x1xf32> -> vector<8x1xf32>
    %212 = vector.broadcast %211 : vector<8x1xf32> to vector<8x8xf32>
    %213 = arith.mulf %208, %212 : vector<8x8xf32>
    %214 = arith.truncf %213 : vector<8x8xf32> to vector<8x8xbf16>
    %cst_78 = arith.constant dense<0.000000e+00> : vector<8x8xf32>
    %215 = tpu.matmul %214, %199, %cst_78 {dimension_numbers = #tpu.dot_dimension_numbers<[1], [0], [0], [1], [0, 0, 1, 1], [], []>} : vector<8x8xbf16>, vector<8x8xbf16>, vector<8x8xf32> -> vector<8x8xf32>
    %216 = arith.truncf %215 : vector<8x8xf32> to vector<8x8xbf16>
    %c1_79 = arith.constant 1 : index
    %c0_80 = arith.constant 0 : index
    %c0_81 = arith.constant 0 : index
    %217 = vector.load %arg10[%c1_79, %c0_80, %c0_81] : memref<4x8x32xbf16, #tpu.memory_space<vmem>>, vector<1x8x32xbf16>
    %218 = vector.shape_cast %217 : vector<1x8x32xbf16> to vector<8x32xbf16>
    %cst_82 = arith.constant dense<0.000000e+00> : vector<8x32xf32>
    %219 = tpu.matmul %216, %218, %cst_82 {dimension_numbers = #tpu.dot_dimension_numbers<[1], [0], [0], [1], [0, 0, 1, 1], [], []>} : vector<8x8xbf16>, vector<8x32xbf16>, vector<8x32xf32> -> vector<8x32xf32>
    %220 = arith.addf %196, %219 : vector<8x32xf32>
    %221 = vector.extract_strided_slice %169 {offsets = [0, 16], sizes = [8, 8], strides = [1, 1]} : vector<8x32xbf16> to vector<8x8xbf16>
    %222 = vector.extract_strided_slice %170 {offsets = [0, 16], sizes = [8, 8], strides = [1, 1]} : vector<8x32xbf16> to vector<8x8xbf16>
    %223 = vector.extract_strided_slice %171 {offsets = [0, 16], sizes = [8, 8], strides = [1, 1]} : vector<8x32xbf16> to vector<8x8xbf16>
    %cst_83 = arith.constant dense<0.000000e+00> : vector<8x8xf32>
    %224 = tpu.matmul %221, %222, %cst_83 {dimension_numbers = #tpu.dot_dimension_numbers<[1], [1], [0], [0], [0, 0, 1, 0], [], []>} : vector<8x8xbf16>, vector<8x8xbf16>, vector<8x8xf32> -> vector<8x8xf32>
    %cst_84 = arith.constant 0.353553385 : f32
    %225 = vector.broadcast %cst_84 : f32 to vector<8x8xf32>
    %226 = arith.mulf %224, %225 : vector<8x8xf32>
    %227 = arith.addf %226, %16 : vector<8x8xf32>
    %cst_85 = arith.constant dense<0xFF800000> : vector<8xf32>
    %228 = vector.multi_reduction <maximumf>, %227, %cst_85 [1] : vector<8x8xf32> to vector<8xf32>
    %229 = vector.shape_cast %228 : vector<8xf32> to vector<8x1xf32>
    %230 = vector.broadcast %229 : vector<8x1xf32> to vector<8x8xf32>
    %231 = arith.subf %227, %230 : vector<8x8xf32>
    %232 = math.exp %231 : vector<8x8xf32>
    %cst_86 = arith.constant dense<0.000000e+00> : vector<8xf32>
    %233 = vector.multi_reduction <add>, %232, %cst_86 [1] : vector<8x8xf32> to vector<8xf32>
    %234 = vector.shape_cast %233 : vector<8xf32> to vector<8x1xf32>
    %235 = tpu.reciprocal %234 {approx = true} : vector<8x1xf32> -> vector<8x1xf32>
    %236 = vector.broadcast %235 : vector<8x1xf32> to vector<8x8xf32>
    %237 = arith.mulf %232, %236 : vector<8x8xf32>
    %238 = arith.truncf %237 : vector<8x8xf32> to vector<8x8xbf16>
    %cst_87 = arith.constant dense<0.000000e+00> : vector<8x8xf32>
    %239 = tpu.matmul %238, %223, %cst_87 {dimension_numbers = #tpu.dot_dimension_numbers<[1], [0], [0], [1], [0, 0, 1, 1], [], []>} : vector<8x8xbf16>, vector<8x8xbf16>, vector<8x8xf32> -> vector<8x8xf32>
    %240 = arith.truncf %239 : vector<8x8xf32> to vector<8x8xbf16>
    %c2_88 = arith.constant 2 : index
    %c0_89 = arith.constant 0 : index
    %c0_90 = arith.constant 0 : index
    %241 = vector.load %arg10[%c2_88, %c0_89, %c0_90] : memref<4x8x32xbf16, #tpu.memory_space<vmem>>, vector<1x8x32xbf16>
    %242 = vector.shape_cast %241 : vector<1x8x32xbf16> to vector<8x32xbf16>
    %cst_91 = arith.constant dense<0.000000e+00> : vector<8x32xf32>
    %243 = tpu.matmul %240, %242, %cst_91 {dimension_numbers = #tpu.dot_dimension_numbers<[1], [0], [0], [1], [0, 0, 1, 1], [], []>} : vector<8x8xbf16>, vector<8x32xbf16>, vector<8x32xf32> -> vector<8x32xf32>
    %244 = arith.addf %220, %243 : vector<8x32xf32>
    %245 = vector.extract_strided_slice %169 {offsets = [0, 24], sizes = [8, 8], strides = [1, 1]} : vector<8x32xbf16> to vector<8x8xbf16>
    %246 = vector.extract_strided_slice %170 {offsets = [0, 24], sizes = [8, 8], strides = [1, 1]} : vector<8x32xbf16> to vector<8x8xbf16>
    %247 = vector.extract_strided_slice %171 {offsets = [0, 24], sizes = [8, 8], strides = [1, 1]} : vector<8x32xbf16> to vector<8x8xbf16>
    %cst_92 = arith.constant dense<0.000000e+00> : vector<8x8xf32>
    %248 = tpu.matmul %245, %246, %cst_92 {dimension_numbers = #tpu.dot_dimension_numbers<[1], [1], [0], [0], [0, 0, 1, 0], [], []>} : vector<8x8xbf16>, vector<8x8xbf16>, vector<8x8xf32> -> vector<8x8xf32>
    %cst_93 = arith.constant 0.353553385 : f32
    %249 = vector.broadcast %cst_93 : f32 to vector<8x8xf32>
    %250 = arith.mulf %248, %249 : vector<8x8xf32>
    %251 = arith.addf %250, %16 : vector<8x8xf32>
    %cst_94 = arith.constant dense<0xFF800000> : vector<8xf32>
    %252 = vector.multi_reduction <maximumf>, %251, %cst_94 [1] : vector<8x8xf32> to vector<8xf32>
    %253 = vector.shape_cast %252 : vector<8xf32> to vector<8x1xf32>
    %254 = vector.broadcast %253 : vector<8x1xf32> to vector<8x8xf32>
    %255 = arith.subf %251, %254 : vector<8x8xf32>
    %256 = math.exp %255 : vector<8x8xf32>
    %cst_95 = arith.constant dense<0.000000e+00> : vector<8xf32>
    %257 = vector.multi_reduction <add>, %256, %cst_95 [1] : vector<8x8xf32> to vector<8xf32>
    %258 = vector.shape_cast %257 : vector<8xf32> to vector<8x1xf32>
    %259 = tpu.reciprocal %258 {approx = true} : vector<8x1xf32> -> vector<8x1xf32>
    %260 = vector.broadcast %259 : vector<8x1xf32> to vector<8x8xf32>
    %261 = arith.mulf %256, %260 : vector<8x8xf32>
    %262 = arith.truncf %261 : vector<8x8xf32> to vector<8x8xbf16>
    %cst_96 = arith.constant dense<0.000000e+00> : vector<8x8xf32>
    %263 = tpu.matmul %262, %247, %cst_96 {dimension_numbers = #tpu.dot_dimension_numbers<[1], [0], [0], [1], [0, 0, 1, 1], [], []>} : vector<8x8xbf16>, vector<8x8xbf16>, vector<8x8xf32> -> vector<8x8xf32>
    %264 = arith.truncf %263 : vector<8x8xf32> to vector<8x8xbf16>
    %c3_97 = arith.constant 3 : index
    %c0_98 = arith.constant 0 : index
    %c0_99 = arith.constant 0 : index
    %265 = vector.load %arg10[%c3_97, %c0_98, %c0_99] : memref<4x8x32xbf16, #tpu.memory_space<vmem>>, vector<1x8x32xbf16>
    %266 = vector.shape_cast %265 : vector<1x8x32xbf16> to vector<8x32xbf16>
    %cst_100 = arith.constant dense<0.000000e+00> : vector<8x32xf32>
    %267 = tpu.matmul %264, %266, %cst_100 {dimension_numbers = #tpu.dot_dimension_numbers<[1], [0], [0], [1], [0, 0, 1, 1], [], []>} : vector<8x8xbf16>, vector<8x32xbf16>, vector<8x32xf32> -> vector<8x32xf32>
    %268 = arith.addf %244, %267 : vector<8x32xf32>
    %c0_101 = arith.constant 0 : index
    %c0_102 = arith.constant 0 : index
    %269 = vector.load %arg11[%c0_101, %c0_102] : memref<1x32xf32, #tpu.memory_space<vmem>>, vector<1x32xf32>
    %270 = vector.broadcast %269 : vector<1x32xf32> to vector<8x32xf32>
    %271 = arith.addf %268, %270 : vector<8x32xf32>
    %272 = arith.addf %153, %271 : vector<8x32xf32>
    %c1_103 = arith.constant 1 : index
    %c0_104 = arith.constant 0 : index
    %273 = vector.load %arg16[%c1_103, %c0_104] : memref<3x32xf32, #tpu.memory_space<vmem>>, vector<1x32xf32>
    %c1_105 = arith.constant 1 : index
    %c0_106 = arith.constant 0 : index
    %274 = vector.load %arg17[%c1_105, %c0_106] : memref<3x32xf32, #tpu.memory_space<vmem>>, vector<1x32xf32>
    %cst_107 = arith.constant dense<0.000000e+00> : vector<8xf32>
    %275 = vector.multi_reduction <add>, %272, %cst_107 [1] : vector<8x32xf32> to vector<8xf32>
    %276 = vector.shape_cast %275 : vector<8xf32> to vector<8x1xf32>
    %cst_108 = arith.constant 3.200000e+01 : f32
    %277 = vector.broadcast %cst_108 : f32 to vector<8x1xf32>
    %278 = arith.divf %276, %277 : vector<8x1xf32>
    %279 = vector.broadcast %278 : vector<8x1xf32> to vector<8x32xf32>
    %280 = arith.subf %272, %279 : vector<8x32xf32>
    %281 = arith.mulf %280, %280 : vector<8x32xf32>
    %cst_109 = arith.constant dense<0.000000e+00> : vector<8xf32>
    %282 = vector.multi_reduction <add>, %281, %cst_109 [1] : vector<8x32xf32> to vector<8xf32>
    %283 = vector.shape_cast %282 : vector<8xf32> to vector<8x1xf32>
    %cst_110 = arith.constant 3.200000e+01 : f32
    %284 = vector.broadcast %cst_110 : f32 to vector<8x1xf32>
    %285 = arith.divf %283, %284 : vector<8x1xf32>
    %286 = vector.broadcast %278 : vector<8x1xf32> to vector<8x32xf32>
    %287 = arith.subf %272, %286 : vector<8x32xf32>
    %cst_111 = arith.constant 9.99999974E-6 : f32
    %288 = vector.broadcast %cst_111 : f32 to vector<8x1xf32>
    %289 = arith.addf %285, %288 : vector<8x1xf32>
    %290 = math.rsqrt %289 : vector<8x1xf32>
    %291 = vector.broadcast %290 : vector<8x1xf32> to vector<8x32xf32>
    %292 = arith.mulf %287, %291 : vector<8x32xf32>
    %293 = vector.broadcast %273 : vector<1x32xf32> to vector<8x32xf32>
    %294 = arith.mulf %292, %293 : vector<8x32xf32>
    %295 = vector.broadcast %274 : vector<1x32xf32> to vector<8x32xf32>
    %296 = arith.addf %294, %295 : vector<8x32xf32>
    %297 = arith.truncf %296 : vector<8x32xf32> to vector<8x32xbf16>
    %c0_112 = arith.constant 0 : index
    %c0_113 = arith.constant 0 : index
    %298 = vector.load %arg12[%c0_112, %c0_113] : memref<32x64xbf16, #tpu.memory_space<vmem>>, vector<32x64xbf16>
    %cst_114 = arith.constant dense<0.000000e+00> : vector<8x64xf32>
    %299 = tpu.matmul %297, %298, %cst_114 {dimension_numbers = #tpu.dot_dimension_numbers<[1], [0], [0], [1], [0, 0, 1, 1], [], []>} : vector<8x32xbf16>, vector<32x64xbf16>, vector<8x64xf32> -> vector<8x64xf32>
    %c0_115 = arith.constant 0 : index
    %c0_116 = arith.constant 0 : index
    %300 = vector.load %arg13[%c0_115, %c0_116] : memref<1x64xf32, #tpu.memory_space<vmem>>, vector<1x64xf32>
    %301 = vector.broadcast %300 : vector<1x64xf32> to vector<8x64xf32>
    %302 = arith.addf %299, %301 : vector<8x64xf32>
    %cst_117 = arith.constant 0.000000e+00 : f32
    %303 = vector.broadcast %cst_117 : f32 to vector<8x64xf32>
    %304 = arith.maximumf %302, %303 : vector<8x64xf32>
    %305 = arith.truncf %304 : vector<8x64xf32> to vector<8x64xbf16>
    %c0_118 = arith.constant 0 : index
    %c0_119 = arith.constant 0 : index
    %306 = vector.load %arg14[%c0_118, %c0_119] : memref<64x32xbf16, #tpu.memory_space<vmem>>, vector<64x32xbf16>
    %cst_120 = arith.constant dense<0.000000e+00> : vector<8x32xf32>
    %307 = tpu.matmul %305, %306, %cst_120 {dimension_numbers = #tpu.dot_dimension_numbers<[1], [0], [0], [1], [0, 0, 1, 1], [], []>} : vector<8x64xbf16>, vector<64x32xbf16>, vector<8x32xf32> -> vector<8x32xf32>
    %c0_121 = arith.constant 0 : index
    %c0_122 = arith.constant 0 : index
    %308 = vector.load %arg15[%c0_121, %c0_122] : memref<1x32xf32, #tpu.memory_space<vmem>>, vector<1x32xf32>
    %309 = vector.broadcast %308 : vector<1x32xf32> to vector<8x32xf32>
    %310 = arith.addf %307, %309 : vector<8x32xf32>
    %311 = arith.addf %296, %310 : vector<8x32xf32>
    %c2_123 = arith.constant 2 : index
    %c0_124 = arith.constant 0 : index
    %312 = vector.load %arg16[%c2_123, %c0_124] : memref<3x32xf32, #tpu.memory_space<vmem>>, vector<1x32xf32>
    %c2_125 = arith.constant 2 : index
    %c0_126 = arith.constant 0 : index
    %313 = vector.load %arg17[%c2_125, %c0_126] : memref<3x32xf32, #tpu.memory_space<vmem>>, vector<1x32xf32>
    %cst_127 = arith.constant dense<0.000000e+00> : vector<8xf32>
    %314 = vector.multi_reduction <add>, %311, %cst_127 [1] : vector<8x32xf32> to vector<8xf32>
    %315 = vector.shape_cast %314 : vector<8xf32> to vector<8x1xf32>
    %cst_128 = arith.constant 3.200000e+01 : f32
    %316 = vector.broadcast %cst_128 : f32 to vector<8x1xf32>
    %317 = arith.divf %315, %316 : vector<8x1xf32>
    %318 = vector.broadcast %317 : vector<8x1xf32> to vector<8x32xf32>
    %319 = arith.subf %311, %318 : vector<8x32xf32>
    %320 = arith.mulf %319, %319 : vector<8x32xf32>
    %cst_129 = arith.constant dense<0.000000e+00> : vector<8xf32>
    %321 = vector.multi_reduction <add>, %320, %cst_129 [1] : vector<8x32xf32> to vector<8xf32>
    %322 = vector.shape_cast %321 : vector<8xf32> to vector<8x1xf32>
    %cst_130 = arith.constant 3.200000e+01 : f32
    %323 = vector.broadcast %cst_130 : f32 to vector<8x1xf32>
    %324 = arith.divf %322, %323 : vector<8x1xf32>
    %325 = vector.broadcast %317 : vector<8x1xf32> to vector<8x32xf32>
    %326 = arith.subf %311, %325 : vector<8x32xf32>
    %cst_131 = arith.constant 9.99999974E-6 : f32
    %327 = vector.broadcast %cst_131 : f32 to vector<8x1xf32>
    %328 = arith.addf %324, %327 : vector<8x1xf32>
    %329 = math.rsqrt %328 : vector<8x1xf32>
    %330 = vector.broadcast %329 : vector<8x1xf32> to vector<8x32xf32>
    %331 = arith.mulf %326, %330 : vector<8x32xf32>
    %332 = vector.broadcast %312 : vector<1x32xf32> to vector<8x32xf32>
    %333 = arith.mulf %331, %332 : vector<8x32xf32>
    %334 = vector.broadcast %313 : vector<1x32xf32> to vector<8x32xf32>
    %335 = arith.addf %333, %334 : vector<8x32xf32>
    %336 = arith.truncf %335 : vector<8x32xf32> to vector<8x32xbf16>
    %c0_132 = arith.constant 0 : index
    %c0_133 = arith.constant 0 : index
    %c0_134 = arith.constant 0 : index
    %337 = vector.load %arg18[%c0_132, %c0_133, %c0_134] : memref<1x8x32xbf16, #tpu.memory_space<vmem>>, vector<1x8x32xbf16>
    %338 = vector.shape_cast %337 : vector<1x8x32xbf16> to vector<8x32xbf16>
    %339 = vector.shape_cast %336 : vector<8x32xbf16> to vector<1x8x32xbf16>
    tpu.vector_store %arg18[%c0_132, %c0_133, %c0_134], %339 {strides = array<i32>} : memref<1x8x32xbf16, #tpu.memory_space<vmem>>, vector<1x8x32xbf16>,
    return
  }
  func.func @transform_0(%arg0: i32, %arg1: memref<2xi32, #tpu.memory_space<smem>>) -> (i32, i32, i32) {
    %c0_i32 = arith.constant 0 : i32
    %c0_i32_0 = arith.constant 0 : i32
    %c0_i32_1 = arith.constant 0 : i32
    return %arg0, %c0_i32, %c0_i32_0 : i32, i32, i32
  }
  func.func @transform_1(%arg0: i32, %arg1: memref<2xi32, #tpu.memory_space<smem>>) -> (i32, i32, i32) {
    %c0_i32 = arith.constant 0 : i32
    %c0_i32_0 = arith.constant 0 : i32
    %c0_i32_1 = arith.constant 0 : i32
    return %arg0, %c0_i32, %c0_i32_0 : i32, i32, i32
  }
  func.func @transform_2(%arg0: i32, %arg1: memref<2xi32, #tpu.memory_space<smem>>) -> (i32, i32) {
    %c0_i32 = arith.constant 0 : i32
    %c0_i32_0 = arith.constant 0 : i32
    %c0_i32_1 = arith.constant 0 : i32
    return %c0_i32, %c0_i32_0 : i32, i32
  }
  func.func @transform_3(%arg0: i32, %arg1: memref<2xi32, #tpu.memory_space<smem>>) -> (i32, i32) {
    %c0_i32 = arith.constant 0 : i32
    %c0_i32_0 = arith.constant 0 : i32
    %c0_i32_1 = arith.constant 0 : i32
    return %c0_i32, %c0_i32_0 : i32, i32
  }
  func.func @transform_4(%arg0: i32, %arg1: memref<2xi32, #tpu.memory_space<smem>>) -> (i32, i32, i32) {
    %c0_i32 = arith.constant 0 : i32
    %c0_i32_0 = arith.constant 0 : i32
    %c0_i32_1 = arith.constant 0 : i32
    %c0_i32_2 = arith.constant 0 : i32
    return %c0_i32, %c0_i32_0, %c0_i32_1 : i32, i32, i32
  }
  func.func @transform_5(%arg0: i32, %arg1: memref<2xi32, #tpu.memory_space<smem>>) -> (i32, i32) {
    %c0_i32 = arith.constant 0 : i32
    %c0_i32_0 = arith.constant 0 : i32
    %c0_i32_1 = arith.constant 0 : i32
    return %c0_i32, %c0_i32_0 : i32, i32
  }
  func.func @transform_6(%arg0: i32, %arg1: memref<2xi32, #tpu.memory_space<smem>>) -> (i32, i32) {
    %c0_i32 = arith.constant 0 : i32
    %c0_i32_0 = arith.constant 0 : i32
    %c0_i32_1 = arith.constant 0 : i32
    return %c0_i32, %c0_i32_0 : i32, i32
  }
  func.func @transform_7(%arg0: i32, %arg1: memref<2xi32, #tpu.memory_space<smem>>) -> (i32, i32) {
    %c0_i32 = arith.constant 0 : i32
    %c0_i32_0 = arith.constant 0 : i32
    %c0_i32_1 = arith.constant 0 : i32
    return %c0_i32, %c0_i32_0 : i32, i32
  }
  func.func @transform_8(%arg0: i32, %arg1: memref<2xi32, #tpu.memory_space<smem>>) -> (i32, i32, i32) {
    %c0_i32 = arith.constant 0 : i32
    %c0_i32_0 = arith.constant 0 : i32
    %c0_i32_1 = arith.constant 0 : i32
    %c0_i32_2 = arith.constant 0 : i32
    return %c0_i32, %c0_i32_0, %c0_i32_1 : i32, i32, i32
  }
  func.func @transform_9(%arg0: i32, %arg1: memref<2xi32, #tpu.memory_space<smem>>) -> (i32, i32) {
    %c0_i32 = arith.constant 0 : i32
    %c0_i32_0 = arith.constant 0 : i32
    %c0_i32_1 = arith.constant 0 : i32
    return %c0_i32, %c0_i32_0 : i32, i32
  }
  func.func @transform_10(%arg0: i32, %arg1: memref<2xi32, #tpu.memory_space<smem>>) -> (i32, i32) {
    %c0_i32 = arith.constant 0 : i32
    %c0_i32_0 = arith.constant 0 : i32
    %c0_i32_1 = arith.constant 0 : i32
    return %c0_i32, %c0_i32_0 : i32, i32
  }
  func.func @transform_11(%arg0: i32, %arg1: memref<2xi32, #tpu.memory_space<smem>>) -> (i32, i32) {
    %c0_i32 = arith.constant 0 : i32
    %c0_i32_0 = arith.constant 0 : i32
    %c0_i32_1 = arith.constant 0 : i32
    return %c0_i32, %c0_i32_0 : i32, i32
  }
  func.func @transform_12(%arg0: i32, %arg1: memref<2xi32, #tpu.memory_space<smem>>) -> (i32, i32) {
    %c0_i32 = arith.constant 0 : i32
    %c0_i32_0 = arith.constant 0 : i32
    %c0_i32_1 = arith.constant 0 : i32
    return %c0_i32, %c0_i32_0 : i32, i32
  }
  func.func @transform_13(%arg0: i32, %arg1: memref<2xi32, #tpu.memory_space<smem>>) -> (i32, i32) {
    %c0_i32 = arith.constant 0 : i32
    %c0_i32_0 = arith.constant 0 : i32
    %c0_i32_1 = arith.constant 0 : i32
    return %c0_i32, %c0_i32_0 : i32, i32
  }
  func.func @transform_14(%arg0: i32, %arg1: memref<2xi32, #tpu.memory_space<smem>>) -> (i32, i32) {
    %c0_i32 = arith.constant 0 : i32
    %c0_i32_0 = arith.constant 0 : i32
    %c0_i32_1 = arith.constant 0 : i32
    return %c0_i32, %c0_i32_0 : i32, i32
  }
  func.func @transform_15(%arg0: i32, %arg1: memref<2xi32, #tpu.memory_space<smem>>) -> (i32, i32) {
    %c0_i32 = arith.constant 0 : i32
    %c0_i32_0 = arith.constant 0 : i32
    %c0_i32_1 = arith.constant 0 : i32
    return %c0_i32, %c0_i32_0 : i32, i32
  }
  func.func @transform_16(%arg0: i32, %arg1: memref<2xi32, #tpu.memory_space<smem>>) -> (i32, i32, i32) {
    %c0_i32 = arith.constant 0 : i32
    %c0_i32_0 = arith.constant 0 : i32
    %c0_i32_1 = arith.constant 0 : i32
    return %arg0, %c0_i32, %c0_i32_0 : i32, i32, i32
  }
}

</mosaic_0001>

<bundles_post_ra>
// kernel: tpu_custom_call.1
= control target key start
LH: loop header
LB: loop body
LE: loop exit
PB: predicated region body
PF: predicated region fallthrough
CT: control target
= control target key end

     0   :  { %s4062_s0 = inlined_call_operand.hbm [shape: s32[2], index: 0, kind: input, shape index: {}]   ;;  %s4063_s1 = inlined_call_operand.hbm [shape: bf16[2,8,32], index: 1, kind: input, shape index: {}]   ;;  %s4064_s2 = inlined_call_operand.hbm [shape: bf16[2,8,32], index: 2, kind: input, shape index: {}]   ;;  %s4065_s3 = inlined_call_operand.vmem [shape: bf16[32,96], index: 3, kind: input, shape index: {}]   ;;  %s4066_s4 = inlined_call_operand.vmem [shape: f32[1,96], index: 4, kind: input, shape index: {}]   ;;  %s4067_s5 = inlined_call_operand.vmem [shape: bf16[4,8,32], index: 5, kind: input, shape index: {}]   ;;  %s4068_s6 = inlined_call_operand.hbm [shape: f32[1,32], index: 6, kind: input, shape index: {}]   ;;  %s4069_s7 = inlined_call_operand.vmem [shape: bf16[32,96], index: 7, kind: input, shape index: {}]   ;;  %s4070_s8 = inlined_call_operand.hbm [shape: f32[1,96], index: 8, kind: input, shape index: {}]   ;;  %s4071_s9 = inlined_call_operand.vmem [shape: bf16[4,8,32], index: 9, kind: input, shape index: {}]   ;;  %s4072_s10 = inlined_call_operand.hbm [shape: f32[1,32], index: 10, kind: input, shape index: {}]   ;;  %s4073_s11 = inlined_call_operand.hbm [shape: bf16[32,64], index: 11, kind: input, shape index: {}]   ;;  %s4074_s12 = inlined_call_operand.vmem [shape: f32[1,64], index: 12, kind: input, shape index: {}]   ;;  %s4075_s13 = inlined_call_operand.vmem [shape: bf16[64,32], index: 13, kind: input, shape index: {}]   ;;  %s4076_s14 = inlined_call_operand.vmem [shape: f32[1,32], index: 14, kind: input, shape index: {}]   ;;  %s4077_s15 = inlined_call_operand.vmem [shape: f32[3,32], index: 15, kind: input, shape index: {}]   ;;  %s4078_s16 = inlined_call_operand.vmem [shape: f32[3,32], index: 16, kind: input, shape index: {}]   ;;  %s4079_s17 = inlined_call_operand.hbm [shape: bf16[2,8,32], index: 17, kind: output, shape index: {}]  }
   0x1   :  { %4093 = sst [smem:[#allocation26_spill]] %s4062_s0 }
   0x2   :  { %4094 = sst [smem:[#allocation27_spill]] %s4063_s1  ;;  %s4105_s26 = sld [smem:[#allocation26_spill]] }
   0x3   :  { %4095 = sst [smem:[#allocation28_spill]] %s4068_s6 }
   0x4   :  { %4096 = sst [smem:[#allocation29_spill]] %s4070_s8 }
   0x5   :  { %4097 = sst [smem:[#allocation30_spill]] %s4071_s9 }
   0x6   :  { %4098 = sst [smem:[#allocation31_spill]] %s4072_s10 }
   0x7   :  { %4099 = sst [smem:[#allocation32_spill]] %s4073_s11 }
   0x8   :  { %4100 = sst [smem:[#allocation33_spill]] %s4074_s12  ;;  %s3008_s9 = scalar_lea.hbm %s4105_s26, 16 }
   0x9   :  { %4101 = sst [smem:[#allocation34_spill]] %s4075_s13  ;;  %p3009_p0 = scmp.ne.s32.totalorder %s4105_s26, %s3008_s9 }
   0xa   :  { %4102 = sst [smem:[#allocation35_spill]] %s4076_s14  ;;  %p3012_p1 = scmp.lt.u32.totalorder %s3008_s9, %s4105_s26 }
   0xb   :  { %4103 = sst [smem:[#allocation36_spill]] %s4078_s16 }
   0xc   :  { %4104 = sst [smem:[#allocation37_spill]] %s4079_s17  ;;  %p3014_p2 = pnand %p3012_p1, %p3009_p0 }
   0xe   :  { %3017 = shalt.err (!%p3014_p2)  }
   0xf   :  { %s3276_s30 = smov [#allocation3]  }
  0x10   :  { %23 = dma.hbm_to_smem %s4105_s26, 16, %s3276_s30, [#allocation2] }
  0x11   :  { %3234 = dma.done.wait [#allocation2], 16 }
  0x12   :  { %3235 = vsyncadd [#allocation2], 4294967280 }
  0x13   :  { %25 = sfence }
  0x14   :  { %26 = vsyncpa [#allocation5], 0 }
  0x15   :  { %28 = vsyncpa [#allocation5 + $0x1], 0 }
  0x16   :  { %29 = vsyncpa [#allocation8], 0 }
  0x17   :  { %31 = vsyncpa [#allocation8 + $0x1], 0 }
  0x18   :  { %32 = vsyncpa [#allocation11], 0 }
  0x19   :  { %33 = vsyncpa [#allocation14], 0 }
  0x1a   :  { %34 = vsyncpa [#allocation6], 0 }
  0x1b   :  { %36 = vsyncpa [#allocation6 + $0x1], 0  ;;  %s3402_s1 = smov 0   ;;  %s3404_s9 = smov 0  }
  0x1c   :  { %s3406_s20 = smov 0   ;;  %s3408_s21 = smov 0  }
  0x1d LB: > { %4106 = sst [smem:[#allocation23_spill]] %s3270_s20  ;;  %s3277_s22 = smov [#allocation9]   ;;  %s3274_s21 = sphi %s3408_s21, %s4140_s21   ;;  %s3270_s20 = sphi %s3406_s20, %s4142_s20   ;;  %s3266_s9 = sphi %s3404_s9, %s4144_s9   ;;  %s3262_s1 = sphi %s3402_s1, %s4143_s1  }
  0x1e   : > { %s441_s23 = sshll.u32 %s3277_s22, 4  ;;  %s3423_s24 = sadd.s32 4294967295, %s3274_s21   ;;  %s3428_s23 = int_to_ptr.vmem [resolvable:$true] %s441_s23 }
  0x1f   : > { %p2519_p3 = scmp.ge.s32.totalorder %s3274_s21, 1  ;;  %p4086_p4 = scmp.eq.s32.totalorder %s3423_s24, 0 }
  0x20   : > { %p419_p5 = scmp.lt.s32.totalorder %s3274_s21, 3  ;;  %s3278_s26 = smov [#allocation10]  }
  0x21   : > { %s455_s27 = sshll.u32 %s3278_s26, 4  ;;  %s3279_s28 = smov [#allocation12]   ;;  %s3437_s27 = int_to_ptr.vmem [resolvable:$true] %s455_s27 }
  0x22   : > { %p3430_p6 = pnand %p2519_p3, %p419_p5  ;;  %s469_s29 = sshll.u32 %s3279_s28, 4  ;;  %s3445_s29 = int_to_ptr.vmem [resolvable:$true] %s469_s29 }
  0x23   : > { %s3280_s30 = smov [#allocation13]   ;;  %s4109_s6 = sld [smem:[#allocation28_spill]] }
  0x24   : > { %s4107_s25 = scalar_select %p3430_p6, 1, 0 }
  0x25   : > { %p2873_p8 = pneg %p3430_p6  ;;  %s3447_s18 = sshll.u32 %s3280_s30, 4  ;;  %s480_s18 = int_to_ptr.vmem [resolvable:$true] %s3447_s18 }
  0x27   : > { %p3441_p9 = pnand %p2873_p8, %p4086_p4 }
  0x29   : > { %s3018_s17 = scalar_lea.hbm %s4109_s6, 16  ;;  %p3457_p11 = pneg %p3441_p9 }
  0x2a   : > { %p3019_p10 = scmp.ne.s32.totalorder %s4109_s6, %s3018_s17  ;;  %p3025_p0 = scmp.lt.u32.totalorder %s3018_s17, %s4109_s6 }
  0x2c   : > { %p3021_p12 = pnand %p3457_p11, %p3019_p10 }
  0x2e   : > { %p3022_p13 = pneg %p3021_p12 }
  0x30   : > { %p3027_p1 = pnand %p3025_p0, %p3022_p13 }
  0x32   : > { %3030 = shalt.err (!%p3027_p1)
}
  0x33   : > { %s3031_s14 = scalar_lea.vmem %s3428_s23, 16  ;;  %s3038_s19 = scalar_lea.vmem %s3428_s23, 32 }
  0x34   : > { %p3032_p2 = scmp.ne.s32.totalorder %s3428_s23, %s3031_s14  ;;  %p3039_p8 = scmp.lt.s32.totalorder %s3428_s23, %s3428_s23 }
  0x35   : > { %p3040_p10 = scmp.lt.s32.totalorder %s3038_s19, %s3031_s14 }
  0x36   : > { %p3034_p3 = pnand %p3032_p2, %p3457_p11 }
  0x37   : > { %p3041_p12 = por %p3040_p10, %p3039_p8 }
  0x38   : > { %p3035_p5 = pneg %p3034_p3 }
  0x3a   : > { %p3042_p7 = pnand %p3041_p12, %p3035_p5 }
  0x3c   : > { %3045 = shalt.err (!%p3042_p7)
}
  0x3d   : > { %2876 = dma.hbm_to_vmem [thread:$0]  (!%p3441_p9), %s4109_s6, 16, %s3428_s23, [#allocation8]  }
  0x3e   : > { %s4111_s8 = sld [smem:[#allocation29_spill]] }
  0x44   : > { %s3046_s30 = scalar_lea.hbm %s4111_s8, 16 }
  0x45   : > { %p3047_p13 = scmp.ne.s32.totalorder %s4111_s8, %s3046_s30  ;;  %p3053_p7 = scmp.lt.u32.totalorder %s3046_s30, %s4111_s8 }
  0x47   : > { %p3049_p0 = pnand %p3047_p13, %p3457_p11 }
  0x49   : > { %p3050_p1 = pneg %p3049_p0 }
  0x4b   : > { %p3055_p2 = pnand %p3053_p7, %p3050_p1 }
  0x4d   : > { %3058 = shalt.err (!%p3055_p2)
}
  0x4e   : > { %s3059_s23 = scalar_lea.vmem %s3437_s27, 16  ;;  %s3066_s13 = scalar_lea.vmem %s3437_s27, 32 }
  0x4f   : > { %p3060_p3 = scmp.ne.s32.totalorder %s3437_s27, %s3059_s23  ;;  %p3067_p10 = scmp.lt.s32.totalorder %s3437_s27, %s3437_s27 }
  0x50   : > { %p3068_p12 = scmp.lt.s32.totalorder %s3066_s13, %s3059_s23 }
  0x51   : > { %p3062_p5 = pnand %p3060_p3, %p3457_p11 }
  0x52   : > { %p3069_p13 = por %p3068_p12, %p3067_p10 }
  0x53   : > { %p3063_p8 = pneg %p3062_p5 }
  0x55   : > { %p3070_p0 = pnand %p3069_p13, %p3063_p8 }
  0x57   : > { %3073 = shalt.err (!%p3070_p0)
}
  0x58   : > { %2879 = dma.hbm_to_vmem [thread:$0]  (!%p3441_p9), %s4111_s8, 16, %s3437_s27, [#allocation11]  }
  0x59   : > { %s4112_s10 = sld [smem:[#allocation31_spill]] }
  0x5f   : > { %s3074_s26 = scalar_lea.hbm %s4112_s10, 16 }
  0x60   : > { %p3075_p1 = scmp.ne.s32.totalorder %s4112_s10, %s3074_s26  ;;  %p3081_p3 = scmp.lt.u32.totalorder %s3074_s26, %s4112_s10 }
  0x62   : > { %p3077_p7 = pnand %p3075_p1, %p3457_p11 }
  0x64   : > { %p3078_p2 = pneg %p3077_p7 }
  0x66   : > { %p3083_p5 = pnand %p3081_p3, %p3078_p2 }
  0x68   : > { %3086 = shalt.err (!%p3083_p5)
}
  0x69   : > { %s3087_s27 = scalar_lea.vmem %s3445_s29, 16  ;;  %s3094_s13 = scalar_lea.vmem %s3445_s29, 32 }
  0x6a   : > { %p3088_p8 = scmp.ne.s32.totalorder %s3445_s29, %s3087_s27  ;;  %p3095_p13 = scmp.lt.s32.totalorder %s3445_s29, %s3445_s29 }
  0x6b   : > { %p3096_p0 = scmp.lt.s32.totalorder %s3094_s13, %s3087_s27 }
  0x6c   : > { %p3090_p10 = pnand %p3088_p8, %p3457_p11 }
  0x6d   : > { %p3097_p1 = por %p3096_p0, %p3095_p13 }
  0x6e   : > { %p3091_p12 = pneg %p3090_p10 }
  0x70   : > { %p3098_p7 = pnand %p3097_p1, %p3091_p12 }
  0x72   : > { %3101 = shalt.err (!%p3098_p7)
}
  0x73   : > { %2882 = dma.hbm_to_vmem [thread:$0]  (!%p3441_p9), %s4112_s10, 16, %s3445_s29, [#allocation11]  }
  0x74   : > { %s4113_s11 = sld [smem:[#allocation32_spill]] }
  0x7a   : > { %s3102_s26 = scalar_lea.hbm %s4113_s11, 256 }
  0x7b   : > { %p3103_p2 = scmp.ne.s32.totalorder %s4113_s11, %s3102_s26  ;;  %p3109_p8 = scmp.lt.u32.totalorder %s3102_s26, %s4113_s11 }
  0x7d   : > { %p3105_p3 = pnand %p3103_p2, %p3457_p11 }
  0x7f   : > { %p3106_p5 = pneg %p3105_p3 }
  0x81   : > { %p3111_p10 = pnand %p3109_p8, %p3106_p5 }
  0x83   : > { %3114 = shalt.err (!%p3111_p10)
}
  0x84   : > { %s3115_s27 = scalar_lea.vmem %s480_s18, 256  ;;  %p3123_p1 = scmp.lt.s32.totalorder %s480_s18, %s480_s18 }
  0x85   : > { %p3116_p12 = scmp.ne.s32.totalorder %s480_s18, %s3115_s27  ;;  %p3124_p7 = scmp.lt.s32.totalorder %s3115_s27, %s3115_s27 }
  0x87   : > { %p3118_p13 = pnand %p3116_p12, %p3457_p11  ;;  %p3125_p4 = por %p3124_p7, %p3123_p1 }
  0x89   : > { %p3119_p0 = pneg %p3118_p13 }
  0x8b   : > { %p3126_p6 = pnand %p3125_p4, %p3119_p0 }
  0x8d   : > { %3129 = shalt.err (!%p3126_p6)
}
  0x8e   : > { %s3281_s29 = smov 64   ;;  %s3282_s28 = smov 4  }
  0x8f   : > { %2885 = dma.hbm_to_vmem [thread:$0]  (!%p3441_p9), %s4113_s11, 256, %s480_s18, [#allocation14], %s3281_s29, %s3281_s29, %s3282_s28  }
  0x90   : > { %s2518_s12 = sadd.s32 4294967294, %s3274_s21   ;;  %s3548_s17 = sadd.s32 1, %s3274_s21  }
  0x91   : > { %4114 = sst [smem:[#allocation24_spill]] %s3548_s17  ;;  %s46_s22 = ssub.s32 %s3274_s21, %s3548_s17 }
  0x92   : > { %s49_s26 = sadd.s32 1, %s3270_s20  ;;  %p47_p4 = scmp.eq.s32.totalorder %s46_s22, 0 }
  0x93   : > { %p56_p6 = scmp.ne.s32.totalorder %s3270_s20, %s3266_s9  ;;  %p57_p11 = scmp.eq.s32.totalorder %s3274_s21, 0 }
  0x94   : > { %p62_p2 = scmp.ne.s32.totalorder %s3266_s9, %s3262_s1  ;;  %p4117_p5 = scmp.eq.s32.totalorder %s3423_s24, 0 }
  0x95   : > { %s3559_s30 = scalar_select %p47_p4, %s3270_s20, %s49_s26  }
  0x96   : > { %p3561_p3 = por %p57_p11, %p56_p6  ;;  %p3567_p9 = por %p4117_p5, %p62_p2 }
  0x97   : > { %4115 = sst [smem:[#allocation25_spill]] %s3559_s30  ;;  %p406_p8 = scmp.eq.s32.totalorder %s3423_s24, 1 }
  0x98   : > { %s4118_s18 = scalar_select %p3567_p9, 1, 0 }
  0x99   : > { %p412_p10 = scmp.eq.s32.totalorder %s2518_s12, 1  ;;  %p2901_p12 = scmp.lt.s32.totalorder %s3274_s21, 2 }
  0x9a   : > { %s508_s14 = sand.u32 1, %s3270_s20   ;;  %p3574_p13 = por %p406_p8, %p56_p6 }
  0x9b   : > { %p3578_p0 = por %p412_p10, %p62_p2  ;;  %s3582_s27 = sshll.u32 %s508_s14, 2 }
  0x9c   : > { %s4119_s19 = scalar_select %p3574_p13, 1, 0 }
  0x9d   : > { %s4120_s23 = scalar_select %p3578_p0, 1, 0 }
  0x9e   : > { %s2526_s29 = sshll.u32 %s3274_s21, 6  ;;  %s4121_s16 = sld [smem:[#allocation27_spill]] }
  0x9f   : > { %s512_s12 = scalar_lea.vmem [#allocation4], %s3582_s27  ;;  %p3595_p1 = pnand %p2901_p12, %p3561_p3 }
  0xa0   : > { %s519_s26 = sshll.u32 %s512_s12, 4  ;;  %s3602_s28 = scalar_lea.hbm %s4064_s2, %s2526_s29  ;;  %s3591_s26 = int_to_ptr.vmem [resolvable:$true] %s519_s26 }
  0xa1   : > { %s526_s13 = sand.u32 1, %s3274_s21   ;;  %s509_s11 = scalar_lea.sflag [#allocation5], %s508_s14 }
  0xa2   : > { %p3132_p4 = pneg %p3595_p1 }
  0xa4   : > { %s3588_s22 = scalar_lea.hbm %s4121_s16, %s2526_s29  ;;  %s3135_s20 = scalar_lea.hbm %s4121_s16, 128 }
  0xa5   : > { %s3130_s30 = scalar_lea.hbm %s3588_s22, 64  ;;  %p3136_p2 = scmp.lt.u32.totalorder %s3588_s22, %s4121_s16 }
  0xa6   : > { %p3131_p7 = scmp.ne.s32.totalorder %s3588_s22, %s3130_s30  ;;  %p3137_p3 = scmp.lt.u32.totalorder %s3135_s20, %s3130_s30 }
  0xa7   : > { %p3139_p8 = scmp.lt.u32.totalorder %s3130_s30, %s3588_s22 }
  0xa8   : > { %p3133_p6 = pnand %p3132_p4, %p3131_p7  ;;  %p3138_p5 = por %p3137_p3, %p3136_p2 }
  0xaa   : > { %p3134_p11 = pneg %p3133_p6  ;;  %p3140_p10 = por %p3139_p8, %p3138_p5 }
  0xac   : > { %p3141_p12 = pnand %p3140_p10, %p3134_p11 }
  0xae   : > { %3144 = shalt.err (!%p3141_p12)
}
  0xaf   : > { %s3145_s10 = scalar_lea.vmem %s3591_s26, 64  ;;  %s3283_s14 = smov [#allocation4]  }
  0xb0   : > { %p3146_p7 = scmp.ne.s32.totalorder %s3591_s26, %s3145_s10  ;;  %s3150_s29 = sshll.u32 %s3283_s14, 4  ;;  %s3151_s29 = int_to_ptr.vmem [resolvable:$false] %s3150_s29 }
  0xb1   : > { %s3152_s17 = scalar_lea.vmem %s3151_s29, 128  ;;  %p3153_p13 = scmp.lt.s32.totalorder %s3591_s26, %s3151_s29 }
  0xb2   : > { %p3148_p6 = pnand %p3146_p7, %p3132_p4  ;;  %p3154_p2 = scmp.lt.s32.totalorder %s3152_s17, %s3145_s10 }
  0xb4   : > { %p3149_p0 = pneg %p3148_p6  ;;  %p3155_p3 = por %p3154_p2, %p3153_p13 }
  0xb6   : > { %p3156_p5 = pnand %p3155_p3, %p3149_p0 }
  0xb8   : > { %3159 = shalt.err (!%p3156_p5)
}
  0xb9   : > { %2889 = dma.hbm_to_vmem [thread:$0]  (!%p3595_p1), %s3588_s22, 64, %s3591_s26, %s509_s11  }
  0xba   : > { %s530_s20 = scalar_lea.vmem [#allocation7], %s3582_s27  ;;  %s527_s0 = scalar_lea.sflag [#allocation8], %s526_s13 }
  0xbb   : > { %s537_s30 = sshll.u32 %s530_s20, 4  ;;  %s3160_s12 = scalar_lea.hbm %s3602_s28, 64  ;;  %s538_s30 = int_to_ptr.vmem [resolvable:$true] %s537_s30 }
  0xbc   : > { %p3161_p13 = scmp.ne.s32.totalorder %s3602_s28, %s3160_s12  ;;  %s3165_s14 = scalar_lea.hbm %s4064_s2, 128 }
  0xbd   : > { %p3166_p8 = scmp.lt.u32.totalorder %s3602_s28, %s4064_s2  ;;  %p3167_p10 = scmp.lt.u32.totalorder %s3165_s14, %s3160_s12 }
  0xbe   : > { %p3163_p0 = pnand %p3161_p13, %p3132_p4  ;;  %p3169_p7 = scmp.lt.u32.totalorder %s3160_s12, %s3602_s28 }
  0xbf   : > { %p3168_p12 = por %p3167_p10, %p3166_p8 }
  0xc0   : > { %p3164_p11 = pneg %p3163_p0 }
  0xc1   : > { %p3170_p6 = por %p3169_p7, %p3168_p12 }
  0xc3   : > { %p3171_p2 = pnand %p3170_p6, %p3164_p11 }
  0xc5   : > { %3174 = shalt.err (!%p3171_p2)
}
  0xc6   : > { %s3175_s11 = scalar_lea.vmem %s538_s30, 64  ;;  %s3284_s27 = smov [#allocation7]  }
  0xc7   : > { %p3176_p3 = scmp.ne.s32.totalorder %s538_s30, %s3175_s11  ;;  %s3180_s22 = sshll.u32 %s3284_s27, 4  ;;  %s3181_s22 = int_to_ptr.vmem [resolvable:$false] %s3180_s22 }
  0xc8   : > { %s3182_s26 = scalar_lea.vmem %s3181_s22, 128  ;;  %p3183_p0 = scmp.lt.s32.totalorder %s538_s30, %s3181_s22 }
  0xc9   : > { %p3178_p5 = pnand %p3176_p3, %p3132_p4  ;;  %p3184_p9 = scmp.lt.s32.totalorder %s3182_s26, %s3175_s11 }
  0xcb   : > { %p3179_p13 = pneg %p3178_p5  ;;  %p3185_p8 = por %p3184_p9, %p3183_p0 }
  0xcd   : > { %p3186_p10 = pnand %p3185_p8, %p3179_p13 }
  0xcf   : > { %3189 = shalt.err (!%p3186_p10)
}
  0xd0   : > { %2892 = dma.hbm_to_vmem [thread:$0]  (!%p3595_p1), %s3602_s28, 64, %s538_s30, %s527_s0  }
  0xd1   : > { %p4123_p11 = scmp.ne.s32.totalorder %s4107_s25, 0 }
  0xd2   : > { %s3655_s13 = sand.u32 (!%p4123_p11), 1, %s3266_s9   ;;  %p4124_p9 = scmp.ne.s32.totalorder (!%p4123_p11), %s4118_s18, 0 }
  0xd3   : > { %546 = sbr.rel (%p4123_p11) target bundleno = 6828 (0x1aac), region = 84  ;;  %s3658_s20 = sshll.u32 (!%p4123_p11), %s3655_s13, 2 }
  0xd4   : > { %s549_s12 = scalar_lea.sflag (!%p4123_p11), [#allocation5], %s3655_s13  ;;  %s552_s8 = scalar_lea.vmem (!%p4123_p11), [#allocation4], %s3658_s20 }
  0xda   : > { %3237 = dma.done.wait (%p4124_p9), %s549_s12, 64  }
  0xdb   : > { %3239 = vsyncadd (%p4124_p9), %s549_s12, 4294967232  ;;  %s557_s6 = sand.u32 1, %s3423_s24   ;;  %s561_s28 = scalar_lea.vmem [#allocation7], %s3658_s20 }
  0xdc   : > { %s558_s25 = scalar_lea.sflag [#allocation8], %s557_s6 }
  0xdd   : > { %3241 = dma.done.wait (%p4124_p9), %s558_s25, 64  }
  0xde   : > { %3243 = vsyncadd (%p4124_p9), %s558_s25, 4294967232  ;;  %p4125_p1 = scmp.eq.s32.totalorder %s3423_s24, 0 }
  0xe0   : > { %3245 = dma.done.wait (%p4125_p1), [#allocation8], 16   ;;  %p4126_p4 = pmov %p4125_p1 }
  0xe1   : > { %p4127_p12 = pmov %p4125_p1 }
  0xe2   : > { %3247 = vsyncadd (%p4126_p4), [#allocation8], 4294967280 }
  0xe3   : > { %3249 = dma.done.wait (%p4127_p12), [#allocation11], 32   ;;  %p4128_p7 = pmov %p4125_p1 }
  0xe4   : > { %p4129_p6 = pmov %p4125_p1 }
  0xe5   : > { %3251 = vsyncadd (%p4128_p7), [#allocation11], 4294967264 }
  0xe6   : > { %3253 = dma.done.wait (%p4129_p6), [#allocation14], 256   ;;  %p4130_p2 = pmov %p4125_p1 }
  0xe7   : > { %v3285_v0 = vmov 0.0   ;;  %vm3286_vm0 = vmmov 0   ;;  %v2960_v1 = vld [vmem:[%s4065_s3] sm:$0xff]   ;;  %v2961_v2 = vld [vmem:[%s4065_s3 + $0x8] sm:$0xff]   ;;  %vm667_vm1 = vcmask 261120   ;;  %s3287_s17 = smov 120   ;;  %v634_v16 = vlaneseq }
  0xe8   : > { %3255 = vsyncadd (%p4130_p2), [#allocation14], 4294967040  ;;  %2663 = vmatprep.subr.bf16.mxu1 %v3285_v0  ;;  %2667 = vmatprep.mubr.msk.bf16.mxu1 %vm3286_vm0, %v3285_v0  ;;  %v3697_v3 = vld [vmem:[%s552_s8] sm:$0xf]  ;;  %s3288_s11 = smov 96   ;;  %s3289_s27 = smov 88  }
  0xe9   : > { %2677 = vmatprep.subr.bf16.mxu0 %v3285_v0  ;;  %2679 = vmatprep.mubr.msk.bf16.mxu0 %vm3286_vm0, %v3285_v0  ;;  %v2537_v4 = vld [vmem:[%s4066_s4] ss:$0 sm:$0xff]  ;;  %vm715_vm2 = vcmask 64512   ;;  %v635_v17 = vshrl.u32 %v634_v16, 7  ;;  %v3726_v18 = vand.u32 127, %v634_v16  ;;  %s3291_s22 = smov 64  }
  0xea   : > { %2664 = vmatpush3.bf16.msra.mxu1 %v2960_v1  ;;  %v3290_v20 = vmov -1e+10   ;;  %s3292_s26 = smov 56   ;;  %s3293_s12 = smov 112   ;;  %vm781_vm4 = vcmask 1043456   ;;  %vm2300_vm6 = vcmask 523264  }
  0xeb   : > { %2665 = vmatprep.subr.bf16.mxu1 %v3285_v0  ;;  %vm638_vm3 = vcmp.le.s32.totalorder %v3726_v18, %v635_v17  ;;  %s3294_s8 = smov 80   ;;  %v826_v57 = vld [vmem:[%s4067_s5] sm:$0xf]  ;;  %v2545_v59 = vld [vmem:[%s4067_s5 + $0x4] sm:$0xf]  ;;  %s3295_s0 = smov 72  }
  0xec   : > { %v3730_v21 = vsel %vm638_vm3, 0.0, %v3290_v20  ;;  %v992_v58 = vsel %vm781_vm4, %v826_v57, 0  ;;  %v946_v60 = vsel %vm781_vm4, %v2545_v59, 0  ;;  %s3296_s10 = smov 104   ;;  %s3297_s14 = smov 48   ;;  %vm2371_vm7 = vcmask 257024  }
  0xed   : > { %s4131_s18 = sld [smem:[#allocation36_spill]]  ;;  %s2374_s25 = scalar_lea.sflag [#allocation6], %s3655_s13 }
  0xee   : > { %2666 = vmatpush3.bf16.msra.mxu1 %v2961_v2  ;;  %p4137_p5 = scmp.ne.s32.totalorder %s4119_s19, 0 }
  0xef   : > { %2671 = vmatprep.subr.bf16.mxu1 %v3285_v0 }
  0xf1   : > { %2668 = vmatmul.mubr.msk.bf16.vlgmr.msra.gmra.mrb[0].mxu1 %vm667_vm1, %v3697_v3 }
  0xf2   : > { %2673 = vmatprep.mubr.msk.bf16.mxu1 %vm3286_vm0, %v3285_v0 }
 0x1c4   : > { %v705_v5 = vpop.f32.mrb[0].mxu1 }
 0x1c5   : > { %v706_v6 = vadd.f32 %v2537_v4, %v705_v5  ;;  %v2669_v7 = vpop.f32.mrb[1].mxu1 }
 0x1c6   : > { %v708_v8 = vpop.f32.mrb[2].mxu1 }
 0x1c7   : > { %v3707_v9 = vpack.c.bf16 %v706_v6, %v706_v6  ;;  %v2670_v10 = vpop.f32.mrb[3].mxu1 }
 0x1c9   : > { %827 = vrot.lane.b32.xlu1 %v3707_v9, %s3287_s17  ;;  %713 = vrot.lane.b32.xlu0 %v3707_v9, %s3288_s11 }
 0x1cd   : > { %829 = vrot.lane.b32.xlu0 %v3707_v9, %s3289_s27 }
 0x23b   : > { %v714_v11 = vpop.permute.xlu0 %713  ;;  %v828_v15 = vpop.permute.xlu1 %827 }
 0x23c   : > { %v720_v12 = vsel %vm715_vm2, %v714_v11, 0 }
 0x23d   : > { %2672 = vmatpush3.bf16.xpose.msra.mxu1 %v720_v12 }
 0x23e   : > { %2683 = vmatprep.subr.bf16.mxu1 %v3285_v0 }
 0x23f   : > { %v830_v13 = vpop.permute.xlu0 %829 }
 0x240   : > { %v835_v14 = vsel %vm715_vm2, %v830_v13, 0 }
 0x244   : > { %2674 = vmatmul.mubr.msk.bf16.vlgmr.msra.gmra.mrb[4].mxu1 %vm715_vm2, %v3707_v9 }
 0x245   : > { %2684 = vmatpush3.bf16.xpose.msra.mxu1 %v835_v14  ;;  %2685 = vmatprep.mubr.msk.bf16.mxu1 %vm3286_vm0, %v3285_v0 }
 0x246   : > { %2695 = vmatprep.subr.bf16.mxu1 %v3285_v0 }
 0x24c   : > { %2686 = vmatmul.mubr.msk.bf16.vlgmr.msra.gmra.mrb[8].mxu1 %vm715_vm2, %v828_v15 }
 0x24d   : > { %2697 = vmatprep.mubr.msk.bf16.mxu1 %vm3286_vm0, %v3285_v0  ;;  %2696 = vmatpush3.bf16.msra.mxu1 %v946_v60 }
 0x24e   : > { %2707 = vmatprep.subr.bf16.mxu1 %v3285_v0 }
 0x317   : > { %v756_v19 = vpop.f32.mrb[4].mxu1 }
 0x318   : > { %v762_v22 = vmul.f32 0.35355338, %v756_v19  ;;  %v2675_v23 = vpop.f32.mrb[5].mxu1 }
 0x319   : > { %v759_v24 = vpop.f32.mrb[6].mxu1 }
 0x31a   : > { %v2676_v25 = vpop.f32.mrb[7].mxu1  ;;  %v763_v26 = vadd.f32 %v762_v22, %v3730_v21 }
 0x31c   : > { %v764_v27 = vsel %vm715_vm2, %v763_v26, -inf }
 0x31d   : > { %765 = vmax.xlane.f32.xlu1 %v764_v27 }
 0x31f   : > { %v871_v28 = vpop.f32.mrb[8].mxu1 }
 0x320   : > { %v877_v29 = vmul.f32 0.35355338, %v871_v28  ;;  %v2687_v30 = vpop.f32.mrb[9].mxu1 }
 0x321   : > { %v874_v31 = vpop.f32.mrb[10].mxu1 }
 0x322   : > { %v2688_v32 = vpop.f32.mrb[11].mxu1  ;;  %v878_v33 = vadd.f32 %v877_v29, %v3730_v21 }
 0x324   : > { %v879_v34 = vsel %vm715_vm2, %v878_v33, -inf }
 0x325   : > { %880 = vmax.xlane.f32.xlu0 %v879_v34 }
 0x3aa   : > { %v766_v35 = vpop.xlane.xlu1 %765 }
 0x3ab   : > { %v767_v36 = vsub.f32 %v763_v26, %v766_v35 }
 0x3ad   : > { %v768_v37 = vmul.f32 1.442695, %v767_v36 }
 0x3af   : > { %2970 = vpow2.f32 %v768_v37 }
 0x3b2   : > { %v881_v38 = vpop.xlane.xlu0 %880 }
 0x3b3   : > { %v882_v39 = vsub.f32 %v878_v33, %v881_v38 }
 0x3b5   : > { %v883_v40 = vmul.f32 1.442695, %v882_v39 }
 0x3b7   : > { %2972 = vpow2.f32 %v883_v40 }
 0x3b9   : > { %v2971_v41 = vpop.eup %2970 }
 0x3ba   : > { %v770_v42 = vsel %vm715_vm2, %v2971_v41, 0.0 }
 0x3bb   : > { %771 = vadd.xlane.f32.xlu0 %v770_v42 }
 0x3c1   : > { %v2973_v43 = vpop.eup %2972 }
 0x3c2   : > { %v885_v44 = vsel %vm715_vm2, %v2973_v43, 0.0 }
 0x3c3   : > { %886 = vadd.xlane.f32.xlu1 %v885_v44 }
 0x3d1   : > { %776 = vrot.lane.b32.xlu0 %v3707_v9, %s3291_s22  ;;  %s4134_s22 = sld [smem:[#allocation33_spill]] }
 0x3d4   : > { %891 = vrot.lane.b32.xlu1 %v3707_v9, %s3292_s26  ;;  %s3298_s26 = smov 40  }
 0x3d5   : > { %1034 = vrot.lane.b32.xlu0 %v3707_v9, %s3293_s12 }
 0x3d8   : > { %1036 = vrot.lane.b32.xlu1 %v3707_v9, %s3294_s8 }
 0x448   : > { %v772_v45 = vpop.xlane.xlu0 %771 }
 0x449   : > { %2974 = vrcp.f32 %v772_v45 }
 0x44c   : > { %v777_v46 = vpop.permute.xlu0 %776 }
 0x44d   : > { %v783_v47 = vsel %vm781_vm4, %v777_v46, 0  ;;  %v2550_v46 = vld [vmem:[%s4067_s5 + $0x8] sm:$0xf] }
 0x44e   : > { %2678 = vmatpush3.bf16.msra.mxu0 %v783_v47  ;;  %v1153_v47 = vsel %vm781_vm4, %v2550_v46, 0 }
 0x44f   : > { %2689 = vmatprep.subr.bf16.mxu0 %v3285_v0 }
 0x450   : > { %v887_v48 = vpop.xlane.xlu1 %886  ;;  %v1035_v12 = vpop.permute.xlu0 %1034 }
 0x451   : > { %2976 = vrcp.f32 %v887_v48 }
 0x453   : > { %v2975_v49 = vpop.eup %2974 }
 0x454   : > { %v774_v50 = vmul.f32 %v2975_v49, %v2971_v41  ;;  %v892_v51 = vpop.permute.xlu1 %891 }
 0x455   : > { %v897_v53 = vsel %vm781_vm4, %v892_v51, 0 }
 0x456   : > { %v775_v52 = vpack.c.bf16 %v774_v50, %v774_v50 }
 0x458   : > { %2680 = vmatmul.mubr.msk.bf16.vlgmr.msra.gmra.mrb[0].mxu0 %vm715_vm2, %v775_v52  ;;  %v1037_v4 = vpop.permute.xlu1 %1036 }
 0x459   : > { %2690 = vmatpush3.bf16.msra.mxu0 %v897_v53  ;;  %2691 = vmatprep.mubr.msk.bf16.mxu0 %vm3286_vm0, %v3285_v0  ;;  %v1042_v10 = vsel %vm715_vm2, %v1037_v4, 0 }
 0x45a   : > { %2701 = vmatprep.subr.bf16.mxu0 %v3285_v0 }
 0x45b   : > { %v2977_v54 = vpop.eup %2976 }
 0x45c   : > { %v889_v55 = vmul.f32 %v2977_v54, %v2973_v43 }
 0x45e   : > { %v890_v56 = vpack.c.bf16 %v889_v55, %v889_v55 }
 0x460   : > { %2692 = vmatmul.mubr.msk.bf16.vlgmr.msra.gmra.mrb[4].mxu0 %vm715_vm2, %v890_v56 }
 0x461   : > { %2703 = vmatprep.mubr.msk.bf16.mxu0 %vm3286_vm0, %v3285_v0  ;;  %2702 = vmatpush3.bf16.msra.mxu0 %v992_v58 }
 0x462   : > { %2713 = vmatprep.subr.bf16.mxu0 %v3285_v0 }
 0x52b   : > { %v819_v61 = vpop.f32.mrb[0].mxu0 }
 0x52c   : > { %v825_v62 = vpack.c.bf16 %v819_v61, %v819_v61  ;;  %v2681_v63 = vpop.f32.mrb[1].mxu0 }
 0x52d   : > { %v822_v1 = vpop.f32.mrb[2].mxu0 }
 0x52e   : > { %v2682_v2 = vpop.f32.mrb[3].mxu0  ;;  %2704 = vmatmul.mubr.msk.bf16.vlgmr.msra.gmra.mrb[8].mxu0 %vm715_vm2, %v825_v62 }
 0x52f   : > { %2715 = vmatprep.mubr.msk.bf16.mxu0 %vm3286_vm0, %v3285_v0 }
 0x533   : > { %v933_v5 = vpop.f32.mrb[4].mxu0 }
 0x534   : > { %v939_v6 = vpack.c.bf16 %v933_v5, %v933_v5  ;;  %v2693_v7 = vpop.f32.mrb[5].mxu0 }
 0x535   : > { %v936_v8 = vpop.f32.mrb[6].mxu0 }
 0x536   : > { %v2694_v11 = vpop.f32.mrb[7].mxu0  ;;  %2698 = vmatmul.mubr.msk.bf16.vlgmr.msra.gmra.mrb[12].mxu1 %vm715_vm2, %v939_v6 }
 0x537   : > { %2708 = vmatpush3.bf16.xpose.msra.mxu1 %v1042_v10  ;;  %2709 = vmatprep.mubr.msk.bf16.mxu1 %vm3286_vm0, %v3285_v0 }
 0x538   : > { %2719 = vmatprep.subr.bf16.mxu1 %v3285_v0 }
 0x53e   : > { %2710 = vmatmul.mubr.msk.bf16.vlgmr.msra.gmra.mrb[16].mxu1 %vm715_vm2, %v1035_v12 }
 0x53f   : > { %2721 = vmatprep.mubr.msk.bf16.mxu1 %vm3286_vm0, %v3285_v0  ;;  %2720 = vmatpush3.bf16.msra.mxu1 %v1153_v47  ;;  %v2557_v47 = vld [vmem:[%s4077_s15] ss:$0 sm:$0xff] }
 0x540   : > { %2731 = vmatprep.subr.bf16.mxu1 %v3285_v0 }
 0x601   : > { %v1028_v13 = vpop.f32.mrb[8].mxu0 }
 0x602   : > { %v2705_v14 = vpop.f32.mrb[9].mxu0 }
 0x603   : > { %v1031_v15 = vpop.f32.mrb[10].mxu0 }
 0x604   : > { %v2706_v16 = vpop.f32.mrb[11].mxu0 }
 0x609   : > { %v982_v17 = vpop.f32.mrb[12].mxu1 }
 0x60a   : > { %v3775_v19 = vadd.f32 %v1028_v13, %v982_v17  ;;  %v2699_v22 = vpop.f32.mrb[13].mxu1 }
 0x60b   : > { %v985_v23 = vpop.f32.mrb[14].mxu1 }
 0x60c   : > { %v2700_v24 = vpop.f32.mrb[15].mxu1 }
 0x60d   : > { %v2556_v24 = vld [vmem:[#allocation9] ss:$0 sm:$0xff] }
 0x611   : > { %v1078_v25 = vpop.f32.mrb[16].mxu1 }
 0x612   : > { %v1084_v26 = vmul.f32 0.35355338, %v1078_v25  ;;  %v2711_v27 = vpop.f32.mrb[17].mxu1 }
 0x613   : > { %v1081_v28 = vpop.f32.mrb[18].mxu1  ;;  %v1366_v27 = vunpack.c.l.bf16 %v3697_v3 }
 0x614   : > { %v2712_v29 = vpop.f32.mrb[19].mxu1  ;;  %v1085_v30 = vadd.f32 %v1084_v26, %v3730_v21 }
 0x616   : > { %v1086_v31 = vsel %vm715_vm2, %v1085_v30, -inf }
 0x617   : > { %1087 = vmax.xlane.f32.xlu1 %v1086_v31 }
 0x628   : > { %1198 = vrot.lane.b32.xlu1 %v3707_v9, %s3295_s0 }
 0x62c   : > { %1196 = vrot.lane.b32.xlu1 %v3707_v9, %s3296_s10 }
 0x6a4   : > { %v1088_v32 = vpop.xlane.xlu1 %1087 }
 0x6a5   : > { %v1089_v33 = vsub.f32 %v1085_v30, %v1088_v32 }
 0x6a7   : > { %v1090_v34 = vmul.f32 1.442695, %v1089_v33  ;;  %v2962_v33 = vld [vmem:[%s4069_s7] sm:$0xff]  }
 0x6a8   : > { %v1199_v42 = vpop.permute.xlu1 %1198 }
 0x6a9   : > { %2978 = vpow2.f32 %v1090_v34  ;;  %v1204_v44 = vsel %vm715_vm2, %v1199_v42, 0  ;;  %v2963_v34 = vld [vmem:[%s4069_s7 + $0x8] sm:$0xff]  }
 0x6ac   : > { %v1197_v45 = vpop.permute.xlu1 %1196 }
 0x6b3   : > { %v2979_v35 = vpop.eup %2978 }
 0x6b4   : > { %v1092_v36 = vsel %vm715_vm2, %v2979_v35, 0.0 }
 0x6b5   : > { %1093 = vadd.xlane.f32.xlu0 %v1092_v36 }
 0x6cb   : > { %1098 = vrot.lane.b32.xlu0 %v3707_v9, %s3297_s14 }
 0x742   : > { %v1094_v37 = vpop.xlane.xlu0 %1093 }
 0x743   : > { %2980 = vrcp.f32 %v1094_v37 }
 0x746   : > { %v1099_v38 = vpop.permute.xlu0 %1098 }
 0x747   : > { %v1104_v39 = vsel %vm781_vm4, %v1099_v38, 0 }
 0x748   : > { %2714 = vmatpush3.bf16.msra.mxu0 %v1104_v39  ;;  %v2559_v39 = vld [vmem:[#allocation10] ss:$0 sm:$0xff] }
 0x749   : > { %2725 = vmatprep.subr.bf16.mxu0 %v3285_v0 }
 0x74d   : > { %v2981_v40 = vpop.eup %2980 }
 0x74e   : > { %v1096_v41 = vmul.f32 %v2981_v40, %v2979_v35 }
 0x750   : > { %v1097_v43 = vpack.c.bf16 %v1096_v41, %v1096_v41 }
 0x752   : > { %2716 = vmatmul.mubr.msk.bf16.vlgmr.msra.gmra.mrb[12].mxu0 %vm715_vm2, %v1097_v43 }
 0x753   : > { %2726 = vmatpush3.bf16.xpose.msra.mxu0 %v1204_v44  ;;  %2727 = vmatprep.mubr.msk.bf16.mxu0 %vm3286_vm0, %v3285_v0 }
 0x754   : > { %2737 = vmatprep.subr.bf16.mxu0 %v3285_v0 }
 0x75a   : > { %2728 = vmatmul.mubr.msk.bf16.vlgmr.msra.gmra.mrb[16].mxu0 %vm715_vm2, %v1197_v45  ;;  %v633_v45 = vld [vmem:[%s561_s28] sm:$0xf]  ;;  %s640_s28 = sld [smem:[#allocation3 + %s3423_s24]] }
 0x75b   : > { %2739 = vmatprep.mubr.msk.bf16.mxu0 %vm3286_vm0, %v3285_v0 }
 0x825   : > { %v1140_v48 = vpop.f32.mrb[12].mxu0 }
 0x826   : > { %v1146_v49 = vpack.c.bf16 %v1140_v48, %v1140_v48  ;;  %v2717_v50 = vpop.f32.mrb[13].mxu0 }
 0x827   : > { %v1143_v51 = vpop.f32.mrb[14].mxu0 }
 0x828   : > { %v2718_v52 = vpop.f32.mrb[15].mxu0  ;;  %2722 = vmatmul.mubr.msk.bf16.vlgmr.msra.gmra.mrb[20].mxu1 %vm715_vm2, %v1146_v49  ;;  %v2558_v49 = vld [vmem:[%s4131_s18] ss:$0 sm:$0xff] }
 0x829   : > { %2733 = vmatprep.mubr.msk.bf16.mxu1 %vm3286_vm0, %v3285_v0 }
 0x82d   : > { %v1240_v53 = vpop.f32.mrb[16].mxu0 }
 0x82e   : > { %v1246_v54 = vmul.f32 0.35355338, %v1240_v53  ;;  %v2729_v55 = vpop.f32.mrb[17].mxu0 }
 0x82f   : > { %v1243_v56 = vpop.f32.mrb[18].mxu0 }
 0x830   : > { %v2730_v57 = vpop.f32.mrb[19].mxu0  ;;  %v1247_v58 = vadd.f32 %v1246_v54, %v3730_v21  ;;  %v2554_v21 = vld [vmem:[%s4067_s5 + $0xc] sm:$0xf] }
 0x832   : > { %v1248_v59 = vsel %vm715_vm2, %v1247_v58, -inf }
 0x833   : > { %1249 = vmax.xlane.f32.xlu0 %v1248_v59 }
 0x849   : > { %1260 = vrot.lane.b32.xlu0 %v3707_v9, %s3298_s26  ;;  %v1315_v9 = vsel %vm781_vm4, %v2554_v21, 0  ;;  %s4133_s26 = sld [smem:[#allocation34_spill]] }
 0x84a   : > { %2738 = vmatpush3.bf16.msra.mxu0 %v1315_v9 }
 0x84b   : > { %2751 = vmatprep.subr.bf16.mxu0 %v3285_v0 }
 0x84d   : > { %1463 = vrot.lane.b32.xlu0 %v2963_v34, %s3288_s11 }
 0x851   : > { %1467 = vrot.lane.b32.xlu0 %v2559_v39, %s3288_s11 }
 0x8c0   : > { %v1250_v60 = vpop.xlane.xlu0 %1249 }
 0x8c1   : > { %v1251_v61 = vsub.f32 %v1247_v58, %v1250_v60 }
 0x8c3   : > { %v1252_v62 = vmul.f32 1.442695, %v1251_v61 }
 0x8c4   : > { %v1261_v63 = vpop.permute.xlu0 %1260 }
 0x8c5   : > { %2982 = vpow2.f32 %v1252_v62  ;;  %v1266_v1 = vsel %vm781_vm4, %v1261_v63, 0 }
 0x8c6   : > { %2732 = vmatpush3.bf16.msra.mxu1 %v1266_v1 }
 0x8c7   : > { %2743 = vmatprep.subr.bf16.mxu1 %v3285_v0 }
 0x8c8   : > { %v1464_v44 = vpop.permute.xlu0 %1463 }
 0x8cc   : > { %v1468_v53 = vpop.permute.xlu0 %1467 }
 0x8cf   : > { %v2983_v2 = vpop.eup %2982 }
 0x8d0   : > { %v1254_v4 = vsel %vm715_vm2, %v2983_v2, 0.0 }
 0x8d1   : > { %1255 = vadd.xlane.f32.xlu1 %v1254_v4 }
 0x8fb   : > { %v1189_v5 = vpop.f32.mrb[20].mxu1 }
 0x8fc   : > { %v1195_v6 = vadd.f32 %v1189_v5, %v3775_v19  ;;  %v2723_v7 = vpop.f32.mrb[21].mxu1 }
 0x8fd   : > { %v1192_v8 = vpop.f32.mrb[22].mxu1 }
 0x8fe   : > { %v2724_v10 = vpop.f32.mrb[23].mxu1 }
 0x95e   : > { %v1256_v11 = vpop.xlane.xlu1 %1255 }
 0x95f   : > { %2984 = vrcp.f32 %v1256_v11 }
 0x969   : > { %v2985_v12 = vpop.eup %2984 }
 0x96a   : > { %v1258_v13 = vmul.f32 %v2985_v12, %v2983_v2 }
 0x96c   : > { %v1259_v14 = vpack.c.bf16 %v1258_v13, %v1258_v13 }
 0x96e   : > { %2734 = vmatmul.mubr.msk.bf16.vlgmr.msra.gmra.mrb[24].mxu1 %vm715_vm2, %v1259_v14 }
 0x96f   : > { %2747 = vmatprep.mubr.msk.bf16.mxu1 %vm3286_vm0, %v3285_v0  ;;  %2744 = vmatpush3.bf16.msra.mxu1 %v2962_v33 }
 0x970   : > { %2745 = vmatprep.subr.bf16.mxu1 %v3285_v0 }
 0x973   : > { %2746 = vmatpush3.bf16.msra.mxu1 %v2963_v34 }
 0x974   : > { %2759 = vmatprep.subr.bf16.mxu1 %v3285_v0 }
 0xa41   : > { %v1302_v15 = vpop.f32.mrb[24].mxu1 }
 0xa42   : > { %v1308_v16 = vpack.c.bf16 %v1302_v15, %v1302_v15  ;;  %v2735_v17 = vpop.f32.mrb[25].mxu1 }
 0xa43   : > { %v1305_v22 = vpop.f32.mrb[26].mxu1 }
 0xa44   : > { %v2736_v23 = vpop.f32.mrb[27].mxu1  ;;  %2740 = vmatmul.mubr.msk.bf16.vlgmr.msra.gmra.mrb[20].mxu0 %vm715_vm2, %v1308_v16 }
 0xa45   : > { %2755 = vmatprep.mubr.msk.bf16.mxu0 %vm3286_vm0, %v3285_v0 }
 0xb17   : > { %v1351_v19 = vpop.f32.mrb[20].mxu0 }
 0xb18   : > { %v1357_v25 = vadd.f32 %v1351_v19, %v1195_v6  ;;  %v2741_v26 = vpop.f32.mrb[21].mxu0  ;;  %v641_v6 = vstv %s640_s28  ;;  %s4135_s28 = sld [smem:[#allocation35_spill]] }
 0xb19   : > { %v1354_v28 = vpop.f32.mrb[22].mxu0  ;;  %vm642_vm5 = vcmp.lt.s32.totalorder %v3726_v18, %v641_v6 }
 0xb1a   : > { %v1365_v29 = vadd.f32 %v2556_v24, %v1357_v25  ;;  %v2742_v30 = vpop.f32.mrb[23].mxu0  ;;  %v3878_v8 = vsel %vm642_vm5, 0.0, %v3290_v20 }
 0xb1c   : > { %v1367_v31 = vadd.f32 %v1366_v27, %v1365_v29 }
 0xb1e   : > { %v1370_v32 = vsel %vm667_vm1, %v1367_v31, 0.0 }
 0xb1f   : > { %1371 = vadd.xlane.f32.xlu1 %v1370_v32 }
 0xbac   : > { %v1372_v3 = vpop.xlane.xlu1 %1371 }
 0xbad   : > { %v1374_v35 = vmul.f32 0.03125, %v1372_v3 }
 0xbaf   : > { %v1375_v36 = vsub.f32 %v1367_v31, %v1374_v35 }
 0xbb1   : > { %v1376_v37 = vmul.f32 %v1375_v36, %v1375_v36 }
 0xbb3   : > { %v1377_v38 = vsel %vm667_vm1, %v1376_v37, 0.0 }
 0xbb4   : > { %1378 = vadd.xlane.f32.xlu1 %v1377_v38 }
 0xbc5   : > { %1461 = vrot.lane.b32.xlu1 %v2962_v33, %s3288_s11 }
 0xc41   : > { %v1379_v40 = vpop.xlane.xlu1 %1378 }
 0xc42   : > { %v1380_v41 = vmul.f32 0.03125, %v1379_v40 }
 0xc44   : > { %v1381_v42 = vadd.f32 1e-05, %v1380_v41 }
 0xc45   : > { %v1462_v43 = vpop.permute.xlu1 %1461 }
 0xc46   : > { %2986 = vrsqrt.f32 %v1381_v42  ;;  %2752 = vmatpush3.bf16.msra.mxu0 %v1462_v43 }
 0xc47   : > { %2753 = vmatprep.subr.bf16.mxu0 %v3285_v0 }
 0xc4a   : > { %2754 = vmatpush3.bf16.msra.mxu0 %v1464_v44 }
 0xc4b   : > { %2765 = vmatprep.subr.bf16.mxu0 %v3285_v0 }
 0xc4d   : > { %2756 = vmatmul.mubr.msk.bf16.vlgmr.msra.gmra.mrb[24].mxu0 %vm667_vm1, %v633_v45 }
 0xc4e   : > { %2767 = vmatprep.mubr.msk.bf16.mxu0 %vm3286_vm0, %v3285_v0 }
 0xc50   : > { %v2987_v46 = vpop.eup %2986 }
 0xc51   : > { %v1383_v48 = vmul.f32 %v2987_v46, %v1375_v36 }
 0xc53   : > { %v1388_v50 = vmul.f32 %v2557_v47, %v1383_v48 }
 0xc55   : > { %v3848_v51 = vadd.f32 %v2558_v49, %v1388_v50 }
 0xc57   : > { %v1394_v52 = vpack.c.bf16 %v3848_v51, %v3848_v51 }
 0xc59   : > { %2748 = vmatmul.mubr.msk.bf16.vlgmr.msra.gmra.mrb[28].mxu1 %vm667_vm1, %v1394_v52 }
 0xc5a   : > { %2761 = vmatprep.mubr.msk.bf16.mxu1 %vm3286_vm0, %v3285_v0 }
 0xd20   : > { %v1507_v54 = vpop.f32.mrb[24].mxu0 }
 0xd21   : > { %v2757_v55 = vpop.f32.mrb[25].mxu0  ;;  %v1508_v56 = vadd.f32 %v1507_v54, %v1468_v53 }
 0xd22   : > { %v1510_v57 = vpop.f32.mrb[26].mxu0 }
 0xd23   : > { %v3855_v58 = vpack.c.bf16 %v1508_v56, %v1508_v56  ;;  %v2758_v59 = vpop.f32.mrb[27].mxu0 }
 0xd25   : > { %1629 = vrot.lane.b32.xlu0 %v3855_v58, %s3287_s17  ;;  %v1519_v60 = vsel %vm715_vm2, %v3855_v58, 0 }
 0xd26   : > { %2760 = vmatpush3.bf16.xpose.msra.mxu1 %v1519_v60 }
 0xd27   : > { %2771 = vmatprep.subr.bf16.mxu1 %v3285_v0 }
 0xd2c   : > { %v1455_v61 = vpop.f32.mrb[28].mxu1 }
 0xd2d   : > { %v1456_v62 = vadd.f32 %v2559_v39, %v1455_v61  ;;  %v2749_v63 = vpop.f32.mrb[29].mxu1 }
 0xd2e   : > { %v1458_v1 = vpop.f32.mrb[30].mxu1 }
 0xd2f   : > { %v3862_v2 = vpack.c.bf16 %v1456_v62, %v1456_v62  ;;  %v2750_v4 = vpop.f32.mrb[31].mxu1 }
 0xd31   : > { %1627 = vrot.lane.b32.xlu1 %v3862_v2, %s3287_s17  ;;  %2762 = vmatmul.mubr.msk.bf16.vlgmr.msra.gmra.mrb[32].mxu1 %vm715_vm2, %v3862_v2 }
 0xd32   : > { %2773 = vmatprep.mubr.msk.bf16.mxu1 %vm3286_vm0, %v3285_v0 }
 0xd97   : > { %v1630_v21 = vpop.permute.xlu0 %1629 }
 0xd98   : > { %v1635_v9 = vsel %vm715_vm2, %v1630_v21, 0 }
 0xd99   : > { %2772 = vmatpush3.bf16.xpose.msra.mxu1 %v1635_v9 }
 0xd9a   : > { %2783 = vmatprep.subr.bf16.mxu1 %v3285_v0 }
 0xda3   : > { %v1628_v5 = vpop.permute.xlu1 %1627 }
 0xda4   : > { %2774 = vmatmul.mubr.msk.bf16.vlgmr.msra.gmra.mrb[36].mxu1 %vm715_vm2, %v1628_v5 }
 0xda5   : > { %2785 = vmatprep.mubr.msk.bf16.mxu1 %vm3286_vm0, %v3285_v0 }
 0xe04   : > { %v1555_v7 = vpop.f32.mrb[32].mxu1 }
 0xe05   : > { %v1561_v10 = vmul.f32 0.35355338, %v1555_v7  ;;  %v2763_v11 = vpop.f32.mrb[33].mxu1 }
 0xe06   : > { %v1558_v12 = vpop.f32.mrb[34].mxu1 }
 0xe07   : > { %v2764_v13 = vpop.f32.mrb[35].mxu1  ;;  %v1562_v14 = vadd.f32 %v1561_v10, %v3878_v8 }
 0xe09   : > { %v1563_v15 = vsel %vm715_vm2, %v1562_v14, -inf }
 0xe0a   : > { %1564 = vmax.xlane.f32.xlu0 %v1563_v15 }
 0xe77   : > { %v1671_v16 = vpop.f32.mrb[36].mxu1 }
 0xe78   : > { %v1677_v17 = vmul.f32 0.35355338, %v1671_v16  ;;  %v2775_v22 = vpop.f32.mrb[37].mxu1 }
 0xe79   : > { %v1674_v23 = vpop.f32.mrb[38].mxu1 }
 0xe7a   : > { %v2776_v19 = vpop.f32.mrb[39].mxu1  ;;  %v1678_v18 = vadd.f32 %v1677_v17, %v3878_v8 }
 0xe7c   : > { %v1679_v24 = vsel %vm715_vm2, %v1678_v18, -inf }
 0xe7d   : > { %1680 = vmax.xlane.f32.xlu1 %v1679_v24 }
 0xe8e   : > { %1576 = vrot.lane.b32.xlu1 %v3855_v58, %s3288_s11 }
 0xe92   : > { %1836 = vrot.lane.b32.xlu1 %v3855_v58, %s3293_s12 }
 0xe96   : > { %1834 = vrot.lane.b32.xlu1 %v3862_v2, %s3293_s12  ;;  %s4132_s12 = sld [smem:[#allocation30_spill]] }
 0xe97   : > { %v1565_v20 = vpop.xlane.xlu0 %1564 }
 0xe98   : > { %v1566_v25 = vsub.f32 %v1562_v14, %v1565_v20 }
 0xe9a   : > { %v1567_v26 = vmul.f32 1.442695, %v1566_v25 }
 0xe9c   : > { %2988 = vpow2.f32 %v1567_v26  ;;  %v2568_v39 = vld [vmem:[%s4132_s12 + $0x4] sm:$0xf]  ;;  %v1625_v45 = vld [vmem:[%s4132_s12] sm:$0xf] }
 0xe9d   : > { %v1746_v40 = vsel %vm781_vm4, %v2568_v39, 0  ;;  %v1792_v48 = vsel %vm781_vm4, %v1625_v45, 0 }
 0xe9e   : > { %2784 = vmatpush3.bf16.msra.mxu1 %v1746_v40 }
 0xe9f   : > { %2795 = vmatprep.subr.bf16.mxu1 %v3285_v0 }
 0xea6   : > { %v2989_v27 = vpop.eup %2988 }
 0xea7   : > { %v1569_v28 = vsel %vm715_vm2, %v2989_v27, 0.0 }
 0xea8   : > { %1570 = vadd.xlane.f32.xlu0 %v1569_v28 }
 0xf0a   : > { %v1681_v29 = vpop.xlane.xlu1 %1680 }
 0xf0b   : > { %v1682_v30 = vsub.f32 %v1678_v18, %v1681_v29 }
 0xf0d   : > { %v1683_v31 = vmul.f32 1.442695, %v1682_v30 }
 0xf0e   : > { %v1577_v32 = vpop.permute.xlu1 %1576 }
 0xf0f   : > { %2990 = vpow2.f32 %v1683_v31  ;;  %v1582_v33 = vsel %vm781_vm4, %v1577_v32, 0 }
 0xf10   : > { %2766 = vmatpush3.bf16.msra.mxu0 %v1582_v33  ;;  %v2573_v33 = vld [vmem:[%s4132_s12 + $0x8] sm:$0xf] }
 0xf11   : > { %2777 = vmatprep.subr.bf16.mxu0 %v3285_v0 }
 0xf12   : > { %v1837_v55 = vpop.permute.xlu1 %1836 }
 0xf13   : > { %v1842_v61 = vsel %vm715_vm2, %v1837_v55, 0 }
 0xf16   : > { %v1835_v63 = vpop.permute.xlu1 %1834 }
 0xf19   : > { %v2991_v34 = vpop.eup %2990 }
 0xf1a   : > { %v1685_v3 = vsel %vm715_vm2, %v2991_v34, 0.0 }
 0xf1b   : > { %1686 = vadd.xlane.f32.xlu0 %v1685_v3 }
 0xf31   : > { %1691 = vrot.lane.b32.xlu0 %v3855_v58, %s3289_s27 }
 0xf35   : > { %v1571_v35 = vpop.xlane.xlu0 %1570 }
 0xf36   : > { %2992 = vrcp.f32 %v1571_v35 }
 0xf40   : > { %v2993_v36 = vpop.eup %2992 }
 0xf41   : > { %v1573_v37 = vmul.f32 %v2993_v36, %v2989_v27 }
 0xf43   : > { %v1574_v38 = vpack.c.bf16 %v1573_v37, %v1573_v37 }
 0xf45   : > { %2768 = vmatmul.mubr.msk.bf16.vlgmr.msra.gmra.mrb[28].mxu0 %vm715_vm2, %v1574_v38 }
 0xf46   : > { %2779 = vmatprep.mubr.msk.bf16.mxu0 %vm3286_vm0, %v3285_v0 }
 0xfa8   : > { %v1687_v41 = vpop.xlane.xlu0 %1686 }
 0xfa9   : > { %2994 = vrcp.f32 %v1687_v41 }
 0xfac   : > { %v1692_v42 = vpop.permute.xlu0 %1691 }
 0xfad   : > { %v1697_v43 = vsel %vm781_vm4, %v1692_v42, 0 }
 0xfae   : > { %2778 = vmatpush3.bf16.msra.mxu0 %v1697_v43 }
 0xfaf   : > { %2789 = vmatprep.subr.bf16.mxu0 %v3285_v0 }
 0xfb3   : > { %v2995_v44 = vpop.eup %2994 }
 0xfb4   : > { %v1689_v46 = vmul.f32 %v2995_v44, %v2991_v34  ;;  %v1953_v34 = vsel %vm781_vm4, %v2573_v33, 0 }
 0xfb6   : > { %v1690_v47 = vpack.c.bf16 %v1689_v46, %v1689_v46 }
 0xfb8   : > { %2780 = vmatmul.mubr.msk.bf16.vlgmr.msra.gmra.mrb[32].mxu0 %vm715_vm2, %v1690_v47 }
 0xfb9   : > { %2790 = vmatpush3.bf16.msra.mxu0 %v1792_v48  ;;  %2791 = vmatprep.mubr.msk.bf16.mxu0 %vm3286_vm0, %v3285_v0 }
 0xfba   : > { %2801 = vmatprep.subr.bf16.mxu0 %v3285_v0 }
0x1018   : > { %v1618_v49 = vpop.f32.mrb[28].mxu0 }
0x1019   : > { %v1624_v50 = vpack.c.bf16 %v1618_v49, %v1618_v49  ;;  %v2769_v52 = vpop.f32.mrb[29].mxu0 }
0x101a   : > { %v1621_v53 = vpop.f32.mrb[30].mxu0  ;;  %v2577_v52 = vld [vmem:[%s4132_s12 + $0xc] sm:$0xf] }
0x101b   : > { %v2770_v54 = vpop.f32.mrb[31].mxu0  ;;  %2792 = vmatmul.mubr.msk.bf16.vlgmr.msra.gmra.mrb[36].mxu0 %vm715_vm2, %v1624_v50 }
0x101c   : > { %2803 = vmatprep.mubr.msk.bf16.mxu0 %vm3286_vm0, %v3285_v0 }
0x108b   : > { %v1733_v56 = vpop.f32.mrb[32].mxu0 }
0x108c   : > { %v1739_v57 = vpack.c.bf16 %v1733_v56, %v1733_v56  ;;  %v2781_v59 = vpop.f32.mrb[33].mxu0 }
0x108d   : > { %v1736_v60 = vpop.f32.mrb[34].mxu0 }
0x108e   : > { %v2782_v62 = vpop.f32.mrb[35].mxu0  ;;  %2786 = vmatmul.mubr.msk.bf16.vlgmr.msra.gmra.mrb[40].mxu1 %vm715_vm2, %v1739_v57 }
0x108f   : > { %2796 = vmatpush3.bf16.xpose.msra.mxu1 %v1842_v61  ;;  %2797 = vmatprep.mubr.msk.bf16.mxu1 %vm3286_vm0, %v3285_v0 }
0x1090   : > { %2807 = vmatprep.subr.bf16.mxu1 %v3285_v0 }
0x1096   : > { %2798 = vmatmul.mubr.msk.bf16.vlgmr.msra.gmra.mrb[44].mxu1 %vm715_vm2, %v1835_v63 }
0x1097   : > { %2809 = vmatprep.mubr.msk.bf16.mxu1 %vm3286_vm0, %v3285_v0  ;;  %2808 = vmatpush3.bf16.msra.mxu1 %v1953_v34 }
0x1098   : > { %2819 = vmatprep.subr.bf16.mxu1 %v3285_v0 }
0x10ee   : > { %v1828_v1 = vpop.f32.mrb[36].mxu0 }
0x10ef   : > { %v2793_v4 = vpop.f32.mrb[37].mxu0 }
0x10f0   : > { %v1831_v21 = vpop.f32.mrb[38].mxu0 }
0x10f1   : > { %v2794_v9 = vpop.f32.mrb[39].mxu0 }
0x1161   : > { %v1782_v5 = vpop.f32.mrb[40].mxu1 }
0x1162   : > { %v3925_v6 = vadd.f32 %v1828_v1, %v1782_v5  ;;  %v2787_v7 = vpop.f32.mrb[41].mxu1 }
0x1163   : > { %v1785_v10 = vpop.f32.mrb[42].mxu1  ;;  %v2579_v7 = vld [vmem:[#allocation12] ss:$0 sm:$0xff] }
0x1164   : > { %v2788_v11 = vpop.f32.mrb[43].mxu1 }
0x1169   : > { %v1878_v12 = vpop.f32.mrb[44].mxu1 }
0x116a   : > { %v1884_v13 = vmul.f32 0.35355338, %v1878_v12  ;;  %v2799_v14 = vpop.f32.mrb[45].mxu1 }
0x116b   : > { %v1881_v15 = vpop.f32.mrb[46].mxu1 }
0x116c   : > { %v2800_v16 = vpop.f32.mrb[47].mxu1  ;;  %v1885_v17 = vadd.f32 %v1884_v13, %v3878_v8 }
0x116e   : > { %v1886_v22 = vsel %vm715_vm2, %v1885_v17, -inf }
0x116f   : > { %1887 = vmax.xlane.f32.xlu0 %v1886_v22 }
0x1185   : > { %1898 = vrot.lane.b32.xlu0 %v3855_v58, %s3294_s8  ;;  %s2595_s8 = sshll.u32 %s3423_s24, 6  ;;  %s3299_s24 = smov [#allocation15]  }
0x1189   : > { %1996 = vrot.lane.b32.xlu0 %v3862_v2, %s3296_s10 }
0x11fc   : > { %v1888_v23 = vpop.xlane.xlu0 %1887 }
0x11fd   : > { %v1889_v19 = vsub.f32 %v1885_v17, %v1888_v23 }
0x11ff   : > { %v1890_v18 = vmul.f32 1.442695, %v1889_v19 }
0x1200   : > { %v1899_v24 = vpop.permute.xlu0 %1898 }
0x1201   : > { %2996 = vpow2.f32 %v1890_v18  ;;  %v1904_v20 = vsel %vm781_vm4, %v1899_v24, 0  ;;  %v2964_v24 = vld [vmem:[#allocation13] sm:$0xff]  }
0x1202   : > { %2802 = vmatpush3.bf16.msra.mxu0 %v1904_v20  ;;  %v2965_v20 = vld [vmem:[#allocation13 + $0x8] sm:$0xff]  }
0x1203   : > { %2813 = vmatprep.subr.bf16.mxu0 %v3285_v0 }
0x1204   : > { %v1997_v32 = vpop.permute.xlu0 %1996 }
0x120b   : > { %v2997_v25 = vpop.eup %2996 }
0x120c   : > { %v1892_v26 = vsel %vm715_vm2, %v2997_v25, 0.0 }
0x120d   : > { %1893 = vadd.xlane.f32.xlu1 %v1892_v26 }
0x121e   : > { %1998 = vrot.lane.b32.xlu1 %v3855_v58, %s3296_s10  ;;  %s630_s10 = scalar_lea.vmem [#allocation15], %s3658_s20  ;;  %s3194_s20 = sshll.u32 %s3299_s24, 4  ;;  %s3195_s20 = int_to_ptr.vmem [resolvable:$false] %s3194_s20 }
0x121f   : > { %s2387_s14 = sshll.u32 %s630_s10, 4  ;;  %s3196_s17 = scalar_lea.vmem %s3195_s20, 128  ;;  %s4020_s14 = int_to_ptr.vmem [resolvable:$true] %s2387_s14 }
0x1220   : > { %p3197_p8 = scmp.lt.s32.totalorder %s4020_s14, %s3195_s20 }
0x129a   : > { %v1894_v27 = vpop.xlane.xlu1 %1893 }
0x129b   : > { %2998 = vrcp.f32 %v1894_v27 }
0x129e   : > { %v1999_v29 = vpop.permute.xlu1 %1998 }
0x129f   : > { %v2004_v31 = vsel %vm715_vm2, %v1999_v29, 0  ;;  %v2580_v29 = vld [vmem:[%s4077_s15 + $0x1] ss:$0 sm:$0xff] }
0x12a5   : > { %v2999_v2 = vpop.eup %2998 }
0x12a6   : > { %v1896_v28 = vmul.f32 %v2999_v2, %v2997_v25  ;;  %v2967_v25 = vld [vmem:[%s4133_s26 + $0x8] sm:$0xff]  }
0x12a8   : > { %v1897_v30 = vpack.c.bf16 %v1896_v28, %v1896_v28 }
0x12aa   : > { %2804 = vmatmul.mubr.msk.bf16.vlgmr.msra.gmra.mrb[40].mxu0 %vm715_vm2, %v1897_v30 }
0x12ab   : > { %2814 = vmatpush3.bf16.xpose.msra.mxu0 %v2004_v31  ;;  %2815 = vmatprep.mubr.msk.bf16.mxu0 %vm3286_vm0, %v3285_v0  ;;  %v2581_v31 = vld [vmem:[%s4131_s18 + $0x1] ss:$0 sm:$0xff] }
0x12ac   : > { %2825 = vmatprep.subr.bf16.mxu0 %v3285_v0 }
0x12b2   : > { %2816 = vmatmul.mubr.msk.bf16.vlgmr.msra.gmra.mrb[44].mxu0 %vm715_vm2, %v1997_v32 }
0x12b3   : > { %2827 = vmatprep.mubr.msk.bf16.mxu0 %vm3286_vm0, %v3285_v0 }
0x137d   : > { %v1940_v3 = vpop.f32.mrb[40].mxu0 }
0x137e   : > { %v1946_v35 = vpack.c.bf16 %v1940_v3, %v1940_v3  ;;  %v2805_v36 = vpop.f32.mrb[41].mxu0  ;;  %v2968_v3 = vld [vmem:[%s4133_s26 + $0x10] sm:$0xff]  }
0x137f   : > { %v1943_v37 = vpop.f32.mrb[42].mxu0  ;;  %v2582_v36 = vld [vmem:[%s4134_s22] ss:$0 sm:$0xff]  ;;  %s4136_s22 = sld [smem:[#allocation37_spill]] }
0x1380   : > { %v2806_v38 = vpop.f32.mrb[43].mxu0  ;;  %2810 = vmatmul.mubr.msk.bf16.vlgmr.msra.gmra.mrb[48].mxu1 %vm715_vm2, %v1946_v35  ;;  %v2969_v35 = vld [vmem:[%s4133_s26 + $0x18] sm:$0xff]  }
0x1381   : > { %2821 = vmatprep.mubr.msk.bf16.mxu1 %vm3286_vm0, %v3285_v0 }
0x1385   : > { %v2040_v39 = vpop.f32.mrb[44].mxu0  ;;  %s4018_s6 = scalar_lea.hbm %s4136_s22, %s2595_s8 }
0x1386   : > { %v2046_v40 = vmul.f32 0.35355338, %v2040_v39  ;;  %v2817_v41 = vpop.f32.mrb[45].mxu0 }
0x1387   : > { %v2043_v42 = vpop.f32.mrb[46].mxu0 }
0x1388   : > { %v2818_v43 = vpop.f32.mrb[47].mxu0  ;;  %v2047_v44 = vadd.f32 %v2046_v40, %v3878_v8  ;;  %v2115_v8 = vsel %vm781_vm4, %v2577_v52, 0 }
0x1389   : > { %2826 = vmatpush3.bf16.msra.mxu0 %v2115_v8 }
0x138a   : > { %v2048_v45 = vsel %vm715_vm2, %v2047_v44, -inf  ;;  %2839 = vmatprep.subr.bf16.mxu0 %v3285_v0 }
0x138b   : > { %2049 = vmax.xlane.f32.xlu1 %v2048_v45 }
0x1418   : > { %v2050_v46 = vpop.xlane.xlu1 %2049 }
0x1419   : > { %v2051_v47 = vsub.f32 %v2047_v44, %v2050_v46 }
0x141b   : > { %v2052_v48 = vmul.f32 1.442695, %v2051_v47 }
0x141d   : > { %3000 = vpow2.f32 %v2052_v48 }
0x1427   : > { %v3001_v49 = vpop.eup %3000 }
0x1428   : > { %v2054_v50 = vsel %vm715_vm2, %v3001_v49, 0.0 }
0x1429   : > { %2055 = vadd.xlane.f32.xlu0 %v2054_v50 }
0x143f   : > { %2060 = vrot.lane.b32.xlu0 %v3855_v58, %s3295_s0 }
0x1453   : > { %v1989_v53 = vpop.f32.mrb[48].mxu1 }
0x1454   : > { %v1995_v54 = vadd.f32 %v1989_v53, %v3925_v6  ;;  %v2811_v55 = vpop.f32.mrb[49].mxu1 }
0x1455   : > { %v1992_v56 = vpop.f32.mrb[50].mxu1 }
0x1456   : > { %v2812_v57 = vpop.f32.mrb[51].mxu1 }
0x14b6   : > { %v2056_v59 = vpop.xlane.xlu0 %2055 }
0x14b7   : > { %3002 = vrcp.f32 %v2056_v59 }
0x14ba   : > { %v2061_v60 = vpop.permute.xlu0 %2060 }
0x14bb   : > { %v2066_v58 = vsel %vm781_vm4, %v2061_v60, 0 }
0x14bc   : > { %2820 = vmatpush3.bf16.msra.mxu1 %v2066_v58  ;;  %v2592_v58 = vld [vmem:[%s4077_s15 + $0x2] ss:$0 sm:$0xff] }
0x14bd   : > { %2831 = vmatprep.subr.bf16.mxu1 %v3285_v0 }
0x14c1   : > { %v3003_v61 = vpop.eup %3002 }
0x14c2   : > { %v2058_v62 = vmul.f32 %v3003_v61, %v3001_v49 }
0x14c4   : > { %v2059_v63 = vpack.c.bf16 %v2058_v62, %v2058_v62  ;;  %v2593_v62 = vld [vmem:[%s4131_s18 + $0x2] ss:$0 sm:$0xff] }
0x14c6   : > { %2822 = vmatmul.mubr.msk.bf16.vlgmr.msra.gmra.mrb[52].mxu1 %vm715_vm2, %v2059_v63 }
0x14c7   : > { %2835 = vmatprep.mubr.msk.bf16.mxu1 %vm3286_vm0, %v3285_v0  ;;  %2832 = vmatpush3.bf16.msra.mxu1 %v2964_v24 }
0x14c8   : > { %2833 = vmatprep.subr.bf16.mxu1 %v3285_v0 }
0x14cb   : > { %2834 = vmatpush3.bf16.msra.mxu1 %v2965_v20 }
0x1599   : > { %v2102_v1 = vpop.f32.mrb[52].mxu1 }
0x159a   : > { %v2108_v4 = vpack.c.bf16 %v2102_v1, %v2102_v1  ;;  %v2823_v21 = vpop.f32.mrb[53].mxu1 }
0x159b   : > { %v2105_v9 = vpop.f32.mrb[54].mxu1 }
0x159c   : > { %v2824_v5 = vpop.f32.mrb[55].mxu1  ;;  %2828 = vmatmul.mubr.msk.bf16.vlgmr.msra.gmra.mrb[48].mxu0 %vm715_vm2, %v2108_v4 }
0x159d   : > { %2847 = vmatprep.mubr.msk.bf16.mxu0 %vm3286_vm0, %v3285_v0 }
0x166f   : > { %v2151_v6 = vpop.f32.mrb[48].mxu0 }
0x1670   : > { %v2157_v10 = vadd.f32 %v2151_v6, %v1995_v54  ;;  %v2829_v11 = vpop.f32.mrb[49].mxu0 }
0x1671   : > { %v2154_v12 = vpop.f32.mrb[50].mxu0 }
0x1672   : > { %v2165_v13 = vadd.f32 %v2579_v7, %v2157_v10  ;;  %v2830_v14 = vpop.f32.mrb[51].mxu0 }
0x1674   : > { %v2166_v15 = vadd.f32 %v2165_v13, %v3848_v51  ;;  %v2966_v51 = vld [vmem:[%s4133_s26] sm:$0xff]  }
0x1675   : > { %2840 = vmatpush3.bf16.msra.mxu0 %v2966_v51 }
0x1676   : > { %v2169_v16 = vsel %vm667_vm1, %v2166_v15, 0.0  ;;  %2841 = vmatprep.subr.bf16.mxu0 %v3285_v0 }
0x1677   : > { %2170 = vadd.xlane.f32.xlu1 %v2169_v16 }
0x1679   : > { %2842 = vmatpush3.bf16.msra.mxu0 %v2967_v25 }
0x167a   : > { %2843 = vmatprep.subr.bf16.mxu0 %v3285_v0 }
0x167d   : > { %2844 = vmatpush3.bf16.msra.mxu0 %v2968_v3 }
0x167e   : > { %2845 = vmatprep.subr.bf16.mxu0 %v3285_v0  ;;  %v2586_v0 = vld [vmem:[%s4135_s28] ss:$0 sm:$0xff]  ;;  %s3190_s28 = scalar_lea.vmem %s4020_s14, 64 }
0x167f   : > { %p3191_p3 = scmp.ne.s32.totalorder %s4020_s14, %s3190_s28  ;;  %p3198_p10 = scmp.lt.s32.totalorder %s3196_s17, %s3190_s28 }
0x1681   : > { %2846 = vmatpush3.bf16.msra.mxu0 %v2969_v35  ;;  %p3192_p13 = pnand %p3191_p3, %p4137_p5  ;;  %p3199_p11 = por %p3198_p10, %p3197_p8 }
0x1683   : > { %p3193_p0 = pneg %p3192_p13 }
0x1685   : > { %p3200_p9 = pnand %p3199_p11, %p3193_p0 }
0x1704   : > { %v2171_v17 = vpop.xlane.xlu1 %2170 }
0x1705   : > { %v2172_v22 = vmul.f32 0.03125, %v2171_v17 }
0x1707   : > { %v2173_v23 = vsub.f32 %v2166_v15, %v2172_v22 }
0x1709   : > { %v2174_v19 = vmul.f32 %v2173_v23, %v2173_v23 }
0x170b   : > { %v2175_v18 = vsel %vm667_vm1, %v2174_v19, 0.0 }
0x170c   : > { %2176 = vadd.xlane.f32.xlu1 %v2175_v18 }
0x1799   : > { %v2177_v26 = vpop.xlane.xlu1 %2176 }
0x179a   : > { %v2178_v27 = vmul.f32 0.03125, %v2177_v26 }
0x179c   : > { %v2179_v2 = vadd.f32 1e-05, %v2178_v27 }
0x179e   : > { %3004 = vrsqrt.f32 %v2179_v2 }
0x17a8   : > { %v3005_v28 = vpop.eup %3004 }
0x17a9   : > { %v2181_v30 = vmul.f32 %v3005_v28, %v2173_v23 }
0x17ab   : > { %v2186_v32 = vmul.f32 %v2580_v29, %v2181_v30 }
0x17ad   : > { %v2191_v33 = vadd.f32 %v2581_v31, %v2186_v32 }
0x17af   : > { %v2192_v34 = vpack.c.bf16 %v2191_v33, %v2191_v33 }
0x17b1   : > { %2836 = vmatmul.mubr.msk.bf16.vlgmr.msra.gmra.mrb[56].mxu1 %vm667_vm1, %v2192_v34 }
0x1884   : > { %v2253_v37 = vpop.f32.mrb[56].mxu1 }
0x1885   : > { %v2254_v38 = vadd.f32 %v2582_v36, %v2253_v37  ;;  %v2837_v39 = vpop.f32.mrb[57].mxu1 }
0x1886   : > { %v2256_v40 = vpop.f32.mrb[58].mxu1 }
0x1887   : > { %v2259_v41 = vmax.f32 %v2254_v38, 0.0  ;;  %v2838_v42 = vpop.f32.mrb[59].mxu1 }
0x1889   : > { %v2260_v43 = vpack.c.bf16 %v2259_v41, %v2259_v41 }
0x188b   : > { %2848 = vmatmul.mubr.msk.bf16.vlgmr.msra.gmra.mrb[52].mxu0 %vm2300_vm6, %v2260_v43 }
0x195e   : > { %v2338_v44 = vpop.f32.mrb[52].mxu0 }
0x195f   : > { %v2339_v45 = vadd.f32 %v2586_v0, %v2338_v44  ;;  %v2849_v46 = vpop.f32.mrb[53].mxu0 }
0x1960   : > { %v2341_v47 = vpop.f32.mrb[54].mxu0 }
0x1961   : > { %v2850_v48 = vpop.f32.mrb[55].mxu0  ;;  %v2344_v49 = vadd.f32 %v2339_v45, %v2191_v33 }
0x1963   : > { %v2347_v50 = vsel %vm667_vm1, %v2344_v49, 0.0 }
0x1964   : > { %2348 = vadd.xlane.f32.xlu1 %v2347_v50 }
0x19f1   : > { %v2349_v52 = vpop.xlane.xlu1 %2348 }
0x19f2   : > { %v2350_v8 = vmul.f32 0.03125, %v2349_v52 }
0x19f4   : > { %v2351_v53 = vsub.f32 %v2344_v49, %v2350_v8 }
0x19f6   : > { %v2352_v54 = vmul.f32 %v2351_v53, %v2351_v53 }
0x19f8   : > { %v2353_v55 = vsel %vm667_vm1, %v2352_v54, 0.0 }
0x19f9   : > { %2354 = vadd.xlane.f32.xlu1 %v2353_v55 }
0x1a86   : > { %v2355_v56 = vpop.xlane.xlu1 %2354 }
0x1a87   : > { %v2356_v57 = vmul.f32 0.03125, %v2355_v56 }
0x1a89   : > { %v2357_v59 = vadd.f32 1e-05, %v2356_v57 }
0x1a8b   : > { %3006 = vrsqrt.f32 %v2357_v59 }
0x1a95   : > { %v3007_v60 = vpop.eup %3006 }
0x1a96   : > { %v2359_v61 = vmul.f32 %v3007_v60, %v2351_v53 }
0x1a98   : > { %v2364_v63 = vmul.f32 %v2592_v58, %v2359_v61 }
0x1a9a   : > { %v2369_v1 = vadd.f32 %v2593_v62, %v2364_v63 }
0x1a9c   : > { %v2370_v4 = vpack.c.bf16 %v2369_v1, %v2369_v1 }
0x1a9e   : > { %2372 = vst.msk [vmem:[%s630_s10] sm:$0xf] %vm2371_vm7, %v2370_v4 }
0x1a9f   : > { %3203 = shalt.err (!%p3200_p9)
}
0x1aa0   : > { %s3204_s13 = scalar_lea.hbm %s4018_s6, 64  ;;  %s3208_s30 = scalar_lea.hbm %s4136_s22, 128 }
0x1aa1   : > { %p3205_p1 = scmp.ne.s32.totalorder %s4018_s6, %s3204_s13  ;;  %p3209_p7 = scmp.lt.u32.totalorder %s4018_s6, %s4136_s22 }
0x1aa2   : > { %p3210_p6 = scmp.lt.u32.totalorder %s3208_s30, %s3204_s13  ;;  %p3212_p3 = scmp.lt.u32.totalorder %s3204_s13, %s4018_s6 }
0x1aa3   : > { %p3206_p4 = pnand %p3205_p1, %p4137_p5 }
0x1aa4   : > { %p3211_p2 = por %p3210_p6, %p3209_p7 }
0x1aa5   : > { %p3207_p12 = pneg %p3206_p4 }
0x1aa6   : > { %p3213_p13 = por %p3212_p3, %p3211_p2 }
0x1aa8   : > { %p3214_p0 = pnand %p3213_p13, %p3207_p12 }
0x1aaa   : > { %3217 = shalt.err (!%p3214_p0)
}
0x1aab   : > { %2871 = dma.vmem_to_hbm [thread:$0]  (%p4137_p5), %s4020_s14, 64, %s4018_s6, %s2374_s25  }
0x1aac PF: > { %s2399_s29 = sand.u32 1, %s3262_s1   ;;  %p4138_p8 = scmp.ne.s32.totalorder %s4120_s23, 0 }
0x1aad   : > { %p4139_p10 = scmp.ge.s32.totalorder %s3274_s21, 2  ;;  %s2400_s0 = scalar_lea.sflag [#allocation6], %s2399_s29 }
0x1aaf   : > { %p2894_p11 = pnand %p4139_p10, %p4138_p8 }
0x1ab1   : > { %3257 = dma.done.wait (!%p2894_p11), %s2400_s0, 64  }
0x1ab2   : > { %3259 = vsyncadd (!%p2894_p11), %s2400_s0, 4294967232  ;;  %s4140_s21 = sld [smem:[#allocation24_spill]]  ;;  %s4141_s28 = sld [smem:[#allocation23_spill]] }
0x1ab3   : > { %s4142_s20 = sld [smem:[#allocation25_spill]]  ;;  %s4143_s1 = smov %s3266_s9 }
0x1ab8   : > { %p39_p9 = scmp.ge.s32.totalorder %s4140_s21, 4   ;;  %s4144_s9 = smov %s4141_s28 }
0x1aba   :  { %41 = sbr.rel (!%p39_p9) target bundleno = 29 (0x1d), region = 164 }
0x1ac1   :  { %2405 = vsyncpa [#allocation5], 1 }
0x1ac2   :  { %2407 = vsyncpa [#allocation5 + $0x1], 1 }
0x1ac3   :  { %2408 = vsyncpa [#allocation8], 1 }
0x1ac4   :  { %2410 = vsyncpa [#allocation8 + $0x1], 1 }
0x1ac5   :  { %2411 = vsyncpa [#allocation11], 1 }
0x1ac6   :  { %2412 = vsyncpa [#allocation14], 1 }
0x1ac7   :  { %2413 = vsyncpa [#allocation6], 1 }
0x1ac8   :  { %2415 = vsyncpa [#allocation6 + $0x1], 1 }

</bundles_post_ra>
